<compile_context>
chip_gen: v7x
topology: tpu7x:2x2x1
jax: 0.10.0
libtpu: 0.0.40
codegen_flags: <defaults>
</compile_context>

<pallas_src>
import functools

import jax
import jax.numpy as jnp
from jax.experimental import pallas as pl
from jax.experimental.pallas import tpu as pltpu

BN_EPS = 1e-5
_VMEM_LIMIT = 48 * 1024 * 1024


def _round_up(x, m):
    return -(-x // m) * m


# ----------------------------- Pallas kernels ------------------------------ #

def _conv_stats_kernel(x_ref, w_ref, mask_ref, y_ref, stats_ref, *, shifts, Lp):
    """Pass 1 of BasicConv2d for one image (one grid step).

    x_ref:     (Hp*Wp + KW-1, Cin)      bf16  flattened spatially-padded input
    w_ref:     (KH*KW*Cin, Coutp)       bf16  folded weights (resident)
    mask_ref:  (Lp, 1)                  f32   1.0 where the flat row is valid
    y_ref:     (Lp, Coutp)              bf16  raw conv output (invalid rows 0)
    stats_ref: (2, Coutp)               f32   per-image [sum; sum-of-squares]
    """
    x = x_ref[...]                                       # (rows_ext, Cin) bf16
    if len(shifts) == 1:
        xcat = x[0:Lp, :]
    else:
        # Fold the KH*KW taps into the contraction dim: one wide MXU matmul.
        xcat = jnp.concatenate([x[s:s + Lp, :] for s in shifts], axis=1)
    acc = jnp.dot(xcat, w_ref[...], preferred_element_type=jnp.float32)
    acc = acc * mask_ref[...]                            # zero padded-W rows

    y_ref[...] = acc.astype(y_ref.dtype)                 # single dense store
    stats_ref[0:1, :] = jnp.sum(acc, axis=0, keepdims=True)
    stats_ref[1:2, :] = jnp.sum(acc * acc, axis=0, keepdims=True)


def _bn_relu_kernel(y_ref, scale_ref, shift_ref, o_ref):
    """Pass 2: fused BatchNorm affine (precomputed scale/shift) + ReLU."""
    y = y_ref[...].astype(jnp.float32)
    o_ref[...] = jnp.maximum(y * scale_ref[...] + shift_ref[...],
                             0.0).astype(o_ref.dtype)


def _maxpool3_kernel(x_ref, o_ref):
    """3x3 / stride-1 / pad-1 max pool for one image; refs are (H, W, C).

    Computed entirely on values (shifted slices with edge replication, which
    equals -inf padding for max); single dense store.
    """
    H, W, _ = o_ref.shape
    v = x_ref[...]
    # horizontal 3-max
    vr = jnp.concatenate([v[:, :1, :], v[:, :W - 1, :]], axis=1)   # v[:, j-1]
    vl = jnp.concatenate([v[:, 1:, :], v[:, W - 1:, :]], axis=1)   # v[:, j+1]
    h = jnp.maximum(jnp.maximum(vr, v), vl)
    # vertical 3-max
    hu = jnp.concatenate([h[:1], h[:H - 1]], axis=0)               # h[i-1]
    hd = jnp.concatenate([h[1:], h[H - 1:]], axis=0)               # h[i+1]
    o_ref[...] = jnp.maximum(jnp.maximum(hu, h), hd)


# ------------------------------ JAX wrappers -------------------------------- #

def conv_bn_relu(x, w, gamma, beta, padding):
    """x: (N, H, W, Cin) f32/bf16; w: (KH, KW, Cin, Cout) f32; stride 1."""
    N, H, W, Cin = x.shape
    KH, KW, _, Cout = w.shape
    ph, pw = padding
    Hp, Wp = H + 2 * ph, W + 2 * pw
    Ho, Wo = Hp - KH + 1, Wp - KW + 1

    Coutp = _round_up(Cout, 128)          # lane-dense stores for every layer
    Lp = Ho * Wp                          # flat (padded-W) output rows / image
    rows_ext = Hp * Wp + (KW - 1)         # + tail so all shifted slices fit
    shifts = tuple(kh * Wp + kw for kh in range(KH) for kw in range(KW))
    M = N * Ho * Wo                       # BatchNorm reduction size

    # --- glue: pad / flatten / cast (bf16 activations) ---
    xp = jnp.pad(x.astype(jnp.bfloat16), ((0, 0), (ph, ph), (pw, pw), (0, 0)))
    xf = xp.reshape(N, Hp * Wp, Cin)
    if KW > 1:
        xf = jnp.pad(xf, ((0, 0), (0, KW - 1), (0, 0)))

    w_pad = w if Coutp == Cout else jnp.pad(
        w, ((0, 0), (0, 0), (0, 0), (0, Coutp - Cout)))
    wf = w_pad.reshape(KH * KW * Cin, Coutp).astype(jnp.bfloat16)
    gamma_p = gamma if Coutp == Cout else jnp.pad(gamma, (0, Coutp - Cout))
    beta_p = beta if Coutp == Cout else jnp.pad(beta, (0, Coutp - Cout))

    mask = ((jnp.arange(Lp, dtype=jnp.int32) % Wp) < Wo)
    mask = mask.astype(jnp.float32).reshape(Lp, 1)

    # --- pass 1: conv (one folded matmul, bf16 -> f32) + per-image BN stats ---
    kern = functools.partial(_conv_stats_kernel, shifts=shifts, Lp=Lp)
    y, stats = pl.pallas_call(
        kern,
        grid=(N,),
        in_specs=[
            pl.BlockSpec((None, rows_ext, Cin), lambda n: (n, 0, 0)),
            pl.BlockSpec((KH * KW * Cin, Coutp), lambda n: (0, 0)),
            pl.BlockSpec((Lp, 1), lambda n: (0, 0)),
        ],
        out_specs=[
            pl.BlockSpec((None, Lp, Coutp), lambda n: (n, 0, 0)),
            pl.BlockSpec((None, 2, Coutp), lambda n: (n, 0, 0)),
        ],
        out_shape=[
            jax.ShapeDtypeStruct((N, Lp, Coutp), jnp.bfloat16),
            jax.ShapeDtypeStruct((N, 2, Coutp), jnp.float32),
        ],
        compiler_params=pltpu.CompilerParams(
            dimension_semantics=("parallel",),
            vmem_limit_bytes=_VMEM_LIMIT),
    )(xf, wf, mask)

    # --- glue: full-M training-mode BN stats -> fused scale/shift (tiny) ---
    s = jnp.sum(stats, axis=0)                               # (2, Coutp)
    mean = s[0] / M
    var = jnp.maximum(s[1] / M - mean * mean, 0.0)           # biased variance
    inv = jax.lax.rsqrt(var + BN_EPS)
    scale = (gamma_p * inv).reshape(1, Coutp).astype(jnp.float32)
    shift = (beta_p - mean * gamma_p * inv).reshape(1, Coutp).astype(jnp.float32)

    # --- pass 2: BN apply + ReLU (elementwise, pipelined/parallel over N) ---
    out = pl.pallas_call(
        _bn_relu_kernel,
        grid=(N,),
        in_specs=[
            pl.BlockSpec((None, Lp, Coutp), lambda n: (n, 0, 0)),
            pl.BlockSpec((1, Coutp), lambda n: (0, 0)),
            pl.BlockSpec((1, Coutp), lambda n: (0, 0)),
        ],
        out_specs=pl.BlockSpec((None, Lp, Coutp), lambda n: (n, 0, 0)),
        out_shape=jax.ShapeDtypeStruct((N, Lp, Coutp), jnp.bfloat16),
        compiler_params=pltpu.CompilerParams(
            dimension_semantics=("parallel",),
            vmem_limit_bytes=_VMEM_LIMIT),
    )(y, scale, shift)

    # crop padded-W / padded-Cout layout back to (N, Ho, Wo, Cout)  (XLA glue)
    return out.reshape(N, Ho, Wp, Coutp)[:, :, :Wo, :Cout]


def maxpool3x3_s1_p1(x):
    """MaxPool2d(kernel_size=3, stride=1, padding=1) on NHWC input."""
    N, H, W, C = x.shape
    return pl.pallas_call(
        _maxpool3_kernel,
        grid=(N,),
        in_specs=[pl.BlockSpec((None, H, W, C), lambda n: (n, 0, 0, 0))],
        out_specs=pl.BlockSpec((None, H, W, C), lambda n: (n, 0, 0, 0)),
        out_shape=jax.ShapeDtypeStruct((N, H, W, C), x.dtype),
        compiler_params=pltpu.CompilerParams(
            dimension_semantics=("parallel",),
            vmem_limit_bytes=_VMEM_LIMIT),
    )(x)


# --------------------------- parameters / model ----------------------------- #

def _make_bcd(key, kh, kw, cin, cout, pad):
    fan_in = kh * kw * cin
    w = jax.random.normal(key, (kh, kw, cin, cout), jnp.float32) / jnp.sqrt(
        jnp.float32(fan_in))
    return {
        "w": w,
        "gamma": jnp.ones((cout,), jnp.float32),   # BatchNorm2d default init
        "beta": jnp.zeros((cout,), jnp.float32),
        "pad": pad,
    }


def init_params(key, in_channels):
    specs = {
        "conv1": [(3, 3, in_channels, 32, (0, 0)),
                  (3, 3, 32, 32, (1, 1)),
                  (3, 3, 32, 64, (1, 1))],
        "branch3x3_conv": [(3, 3, 64, 96, (1, 1))],
        "branch7x7a": [(1, 1, 160, 64, (0, 0)),
                       (7, 1, 64, 64, (3, 0)),
                       (1, 7, 64, 64, (0, 3)),
                       (3, 3, 64, 96, (1, 1))],
        "branch7x7b": [(1, 1, 160, 64, (0, 0)),
                       (3, 3, 64, 96, (1, 1))],
        "branchpoolb": [(3, 3, 192, 192, (1, 1))],
    }
    params = {}
    for name, layers in specs.items():
        keys = jax.random.split(key, len(layers) + 1)
        key = keys[0]
        params[name] = [_make_bcd(k, *s) for k, s in zip(keys[1:], layers)]
    return params


def _apply_seq(x, layer_params):
    for p in layer_params:
        x = conv_bn_relu(x, p["w"], p["gamma"], p["beta"], p["pad"])
    return x


def inception_stem(x_nchw, params):
    # NCHW (PyTorch) -> NHWC internal
    x = jnp.transpose(x_nchw, (0, 2, 3, 1)).astype(jnp.float32)

    x = _apply_seq(x, params["conv1"])                           # (N, H-2, W-2, 64)

    x = jnp.concatenate([_apply_seq(x, params["branch3x3_conv"]),    # 96
                         maxpool3x3_s1_p1(x)],                        # 64
                        axis=-1)                                      # -> 160

    # Fuse the twin 1x1 convs (both read the same 160-ch input) into one
    # Cout=128 conv: exact (BN is per-channel) and lane-dense.
    pa, pb = params["branch7x7a"][0], params["branch7x7b"][0]
    w01 = jnp.concatenate([pa["w"], pb["w"]], axis=3)
    g01 = jnp.concatenate([pa["gamma"], pb["gamma"]])
    b01 = jnp.concatenate([pa["beta"], pb["beta"]])
    y01 = conv_bn_relu(x, w01, g01, b01, (0, 0))                      # (N,H,W,128)
    ya = _apply_seq(y01[..., :64], params["branch7x7a"][1:])          # -> 96
    yb = _apply_seq(y01[..., 64:], params["branch7x7b"][1:])          # -> 96
    x = jnp.concatenate([ya, yb], axis=-1)                            # -> 192

    x = jnp.concatenate([maxpool3x3_s1_p1(x),                         # 192
                         _apply_seq(x, params["branchpoolb"])],       # 192
                        axis=-1)                                      # -> 384

    # back to NCHW / f32 to match the PyTorch reference
    return jnp.transpose(x, (0, 3, 1, 2)).astype(jnp.float32)


# ---------------------------------- main ------------------------------------ #

if __name__ == "__main__":
    key = jax.random.PRNGKey(0)
    kx, kp = jax.random.split(key)

    # small shapes consistent with the module: batch=2, channels=4, spatial=16
    x = jax.random.normal(kx, (2, 4, 16, 16), jnp.float32)   # NCHW
    params = init_params(kp, in_channels=4)

    out = inception_stem(x, params)
    out = jax.block_until_ready(out)

    assert out.shape == (2, 384, 14, 14), out.shape
    assert out.dtype == jnp.float32
    assert bool(jnp.all(jnp.isfinite(out)))
    assert bool(jnp.all(out >= 0.0))   # ReLU output

    print("KERNEL_OK")
</pallas_src>

<mosaic_0001>
module attributes {stable_mosaic.version = 11 : i64} {
  func.func @_conv_stats_kernel(%arg0: i32, %arg1: memref<1x258x4xbf16, #tpu.memory_space<vmem>>, %arg2: memref<36x128xbf16, #tpu.memory_space<vmem>>, %arg3: memref<224x1xf32, #tpu.memory_space<vmem>>, %arg4: memref<1x224x128xbf16, #tpu.memory_space<vmem>>, %arg5: memref<1x2x128xf32, #tpu.memory_space<vmem>>) attributes {dimension_semantics = [#tpu.dimension_semantics<parallel>], iteration_bounds = array<i64: 2>, scalar_prefetch = 0 : i64, scratch_operands = 0 : i64, tpu.core_type = #tpu.core_type<tc>, window_params = [{transform_indices = @transform_0, window_bounds = array<i64: 1, 258, 4>}, {pipeline_mode = #tpu.pipeline_mode<synchronous>, transform_indices = @transform_1, window_bounds = array<i64: 36, 128>}, {pipeline_mode = #tpu.pipeline_mode<synchronous>, transform_indices = @transform_2, window_bounds = array<i64: 224, 1>}, {transform_indices = @transform_3, window_bounds = array<i64: 1, 224, 128>}, {transform_indices = @transform_4, window_bounds = array<i64: 1, 2, 128>}]} {
    %c0 = arith.constant 0 : index
    %c0_0 = arith.constant 0 : index
    %c0_1 = arith.constant 0 : index
    %0 = vector.load %arg1[%c0, %c0_0, %c0_1] : memref<1x258x4xbf16, #tpu.memory_space<vmem>>, vector<1x258x4xbf16>
    %1 = vector.shape_cast %0 : vector<1x258x4xbf16> to vector<258x4xbf16>
    %2 = vector.extract_strided_slice %1 {offsets = [0, 0], sizes = [224, 4], strides = [1, 1]} : vector<258x4xbf16> to vector<224x4xbf16>
    %3 = vector.extract_strided_slice %1 {offsets = [1, 0], sizes = [224, 4], strides = [1, 1]} : vector<258x4xbf16> to vector<224x4xbf16>
    %4 = vector.extract_strided_slice %1 {offsets = [2, 0], sizes = [224, 4], strides = [1, 1]} : vector<258x4xbf16> to vector<224x4xbf16>
    %5 = vector.extract_strided_slice %1 {offsets = [16, 0], sizes = [224, 4], strides = [1, 1]} : vector<258x4xbf16> to vector<224x4xbf16>
    %6 = vector.extract_strided_slice %1 {offsets = [17, 0], sizes = [224, 4], strides = [1, 1]} : vector<258x4xbf16> to vector<224x4xbf16>
    %7 = vector.extract_strided_slice %1 {offsets = [18, 0], sizes = [224, 4], strides = [1, 1]} : vector<258x4xbf16> to vector<224x4xbf16>
    %8 = vector.extract_strided_slice %1 {offsets = [32, 0], sizes = [224, 4], strides = [1, 1]} : vector<258x4xbf16> to vector<224x4xbf16>
    %9 = vector.extract_strided_slice %1 {offsets = [33, 0], sizes = [224, 4], strides = [1, 1]} : vector<258x4xbf16> to vector<224x4xbf16>
    %10 = vector.extract_strided_slice %1 {offsets = [34, 0], sizes = [224, 4], strides = [1, 1]} : vector<258x4xbf16> to vector<224x4xbf16>
    %11 = tpu.concatenate %2, %3, %4, %5, %6, %7, %8, %9, %10 in 1 : vector<224x4xbf16>, vector<224x4xbf16>, vector<224x4xbf16>, vector<224x4xbf16>, vector<224x4xbf16>, vector<224x4xbf16>, vector<224x4xbf16>, vector<224x4xbf16>, vector<224x4xbf16> -> vector<224x36xbf16>
    %c0_2 = arith.constant 0 : index
    %c0_3 = arith.constant 0 : index
    %12 = vector.load %arg2[%c0_2, %c0_3] : memref<36x128xbf16, #tpu.memory_space<vmem>>, vector<36x128xbf16>
    %cst = arith.constant dense<0.000000e+00> : vector<224x128xf32>
    %13 = tpu.matmul %11, %12, %cst {dimension_numbers = #tpu.dot_dimension_numbers<[1], [0], [0], [1], [0, 0, 1, 1], [], []>} : vector<224x36xbf16>, vector<36x128xbf16>, vector<224x128xf32> -> vector<224x128xf32>
    %c0_4 = arith.constant 0 : index
    %c0_5 = arith.constant 0 : index
    %14 = vector.load %arg3[%c0_4, %c0_5] : memref<224x1xf32, #tpu.memory_space<vmem>>, vector<224x1xf32>
    %15 = vector.broadcast %14 : vector<224x1xf32> to vector<224x128xf32>
    %16 = arith.mulf %13, %15 : vector<224x128xf32>
    %17 = arith.truncf %16 : vector<224x128xf32> to vector<224x128xbf16>
    %c0_6 = arith.constant 0 : index
    %c0_7 = arith.constant 0 : index
    %c0_8 = arith.constant 0 : index
    %18 = vector.load %arg4[%c0_6, %c0_7, %c0_8] : memref<1x224x128xbf16, #tpu.memory_space<vmem>>, vector<1x224x128xbf16>
    %19 = vector.shape_cast %18 : vector<1x224x128xbf16> to vector<224x128xbf16>
    %20 = vector.shape_cast %17 : vector<224x128xbf16> to vector<1x224x128xbf16>
    tpu.vector_store %arg4[%c0_6, %c0_7, %c0_8], %20 {strides = array<i32>} : memref<1x224x128xbf16, #tpu.memory_space<vmem>>, vector<1x224x128xbf16>,
    %cst_9 = arith.constant dense<0.000000e+00> : vector<128xf32>
    %21 = vector.multi_reduction <add>, %16, %cst_9 [0] : vector<224x128xf32> to vector<128xf32>
    %22 = vector.shape_cast %21 : vector<128xf32> to vector<1x128xf32>
    %c0_10 = arith.constant 0 : index
    %c0_11 = arith.constant 0 : index
    %c0_12 = arith.constant 0 : index
    %23 = vector.load %arg5[%c0_10, %c0_11, %c0_12] : memref<1x2x128xf32, #tpu.memory_space<vmem>>, vector<1x1x128xf32>
    %24 = vector.shape_cast %23 : vector<1x1x128xf32> to vector<1x128xf32>
    %25 = vector.shape_cast %22 : vector<1x128xf32> to vector<1x1x128xf32>
    tpu.vector_store %arg5[%c0_10, %c0_11, %c0_12], %25 {strides = array<i32>} : memref<1x2x128xf32, #tpu.memory_space<vmem>>, vector<1x1x128xf32>,
    %26 = arith.mulf %16, %16 : vector<224x128xf32>
    %cst_13 = arith.constant dense<0.000000e+00> : vector<128xf32>
    %27 = vector.multi_reduction <add>, %26, %cst_13 [0] : vector<224x128xf32> to vector<128xf32>
    %28 = vector.shape_cast %27 : vector<128xf32> to vector<1x128xf32>
    %c0_14 = arith.constant 0 : index
    %c1 = arith.constant 1 : index
    %c0_15 = arith.constant 0 : index
    %29 = vector.load %arg5[%c0_14, %c1, %c0_15] : memref<1x2x128xf32, #tpu.memory_space<vmem>>, vector<1x1x128xf32>
    %30 = vector.shape_cast %29 : vector<1x1x128xf32> to vector<1x128xf32>
    %31 = vector.shape_cast %28 : vector<1x128xf32> to vector<1x1x128xf32>
    tpu.vector_store %arg5[%c0_14, %c1, %c0_15], %31 {strides = array<i32>} : memref<1x2x128xf32, #tpu.memory_space<vmem>>, vector<1x1x128xf32>,
    return
  }
  func.func @transform_0(%arg0: i32) -> (i32, i32, i32) {
    %c0_i32 = arith.constant 0 : i32
    %c0_i32_0 = arith.constant 0 : i32
    %c0_i32_1 = arith.constant 0 : i32
    return %arg0, %c0_i32, %c0_i32_0 : i32, i32, i32
  }
  func.func @transform_1(%arg0: i32) -> (i32, i32) {
    %c0_i32 = arith.constant 0 : i32
    %c0_i32_0 = arith.constant 0 : i32
    %c0_i32_1 = arith.constant 0 : i32
    return %c0_i32, %c0_i32_0 : i32, i32
  }
  func.func @transform_2(%arg0: i32) -> (i32, i32) {
    %c0_i32 = arith.constant 0 : i32
    %c0_i32_0 = arith.constant 0 : i32
    %c0_i32_1 = arith.constant 0 : i32
    return %c0_i32, %c0_i32_0 : i32, i32
  }
  func.func @transform_3(%arg0: i32) -> (i32, i32, i32) {
    %c0_i32 = arith.constant 0 : i32
    %c0_i32_0 = arith.constant 0 : i32
    %c0_i32_1 = arith.constant 0 : i32
    return %arg0, %c0_i32, %c0_i32_0 : i32, i32, i32
  }
  func.func @transform_4(%arg0: i32) -> (i32, i32, i32) {
    %c0_i32 = arith.constant 0 : i32
    %c0_i32_0 = arith.constant 0 : i32
    %c0_i32_1 = arith.constant 0 : i32
    return %arg0, %c0_i32, %c0_i32_0 : i32, i32, i32
  }
}

</mosaic_0001>

<bundles_post_ra>
// kernel: tpu_custom_call.1
= control target key start
LH: loop header
LB: loop body
LE: loop exit
PB: predicated region body
PF: predicated region fallthrough
CT: control target
= control target key end

     0   :  { %10 = vsyncpa [#allocation3], 0  ;;  %s2842_s0 = inlined_call_operand.vmem [shape: bf16[2,258,4], index: 0, kind: input, shape index: {}]   ;;  %s2843_s1 = inlined_call_operand.vmem [shape: bf16[36,128], index: 1, kind: input, shape index: {}]   ;;  %s2844_s2 = inlined_call_operand.vmem [shape: f32[224,1], index: 2, kind: input, shape index: {}]   ;;  %s2845_s3 = inlined_call_operand.hbm [shape: bf16[2,224,128], index: 3, kind: output, shape index: {0}]   ;;  %s2846_s4 = inlined_call_operand.hbm [shape: f32[2,2,128], index: 4, kind: output, shape index: {1}]  }
   0x1   :  { %12 = vsyncpa [#allocation3 + $0x1], 0 }
   0x2   :  { %13 = vsyncpa [#allocation5], 0 }
   0x3   :  { %15 = vsyncpa [#allocation5 + $0x1], 0  ;;  %s2178_s15 = smov 0   ;;  %s2180_s16 = smov 0  }
   0x4   :  { %s2182_s17 = smov 0   ;;  %s2184_s18 = smov 0  }
   0x5 LB: > { %s2199_s19 = sadd.s32 4294967295, %s2139_s18   ;;  %s1719_s20 = sadd.s32 4294967294, %s2139_s18   ;;  %s2139_s18 = sphi %s2184_s18, %s2852_s18   ;;  %s2135_s17 = sphi %s2182_s17, %s2851_s17   ;;  %s2131_s16 = sphi %s2180_s16, %s2850_s16   ;;  %s2127_s15 = sphi %s2178_s15, %s2849_s15  }
   0x6   : > { %s2203_s21 = sadd.s32 1, %s2139_s18   ;;  %s96_s22 = sadd.s32 1, %s2135_s17 }
   0x7   : > { %s93_s23 = ssub.s32 %s2139_s18, %s2203_s21  ;;  %p106_p0 = scmp.ne.s32.totalorder %s2135_s17, %s2131_s16 }
   0x8   : > { %p94_p1 = scmp.eq.s32.totalorder %s93_s23, 0  ;;  %p107_p2 = scmp.eq.s32.totalorder %s2199_s19, 1 }
   0x9   : > { %p112_p3 = scmp.ne.s32.totalorder %s2131_s16, %s2127_s15  ;;  %p113_p4 = scmp.eq.s32.totalorder %s1719_s20, 1 }
   0xa   : > { %s2214_s24 = scalar_select %p94_p1, %s2135_s17, %s96_s22  }
   0xb   : > { %p2216_p5 = por %p107_p2, %p106_p0  ;;  %p2220_p6 = por %p113_p4, %p112_p3 }
   0xc   : > { %p1722_p7 = scmp.ge.s32.totalorder %s2139_s18, 1  ;;  %p171_p8 = scmp.lt.s32.totalorder %s2139_s18, 3 }
   0xe   : > { %p172_p9 = pnand %p1722_p7, %p171_p8 }
   0xf   : > { %p202_p10 = scmp.lt.s32.totalorder (!%p172_p9), %s2199_s19, 1  ;;  %vm459_vm0 = vcmask (!%p172_p9), 1046528   ;;  %s2141_s6 = smov (!%p172_p9), 12   ;;  %vm314_vm1 = vsmask.f32 (!%p172_p9), 7424  ;;  %v2034_v28 = vld [vmem:[%s2843_s1] sm:$0xff] (!%p172_p9)  }
  0x10   : > { %175 = sbr.rel (%p172_p9) target bundleno = 628 (0x274), region = 32  ;;  %s2142_s7 = smov (!%p172_p9), 20   ;;  %v2035_v29 = vld [vmem:[%s2843_s1 + $0x8] sm:$0xff] (!%p172_p9)   ;;  %1922 = vmatprep.subr.bf16.mxu0 (!%p172_p9), %v2034_v28  ;;  %1956 = vmatprep.subr.bf16.mxu1 (!%p172_p9), %v2034_v28  ;;  %v2037_v35 = vld [vmem:[%s2843_s1 + $0x10] ss:$0 sps:$4 sm:$0x33] (!%p172_p9)  }
  0x11   : > { %s2143_s8 = smov (!%p172_p9), 8   ;;  %s2144_s9 = smov (!%p172_p9), 4   ;;  %1923 = vmatpush3.bf16.msra.mxu0 (!%p172_p9), %v2034_v28  ;;  %1959 = vmatpush3.bf16.msra.mxu1 (!%p172_p9), %v2034_v28  ;;  %vm1012_vm2 = vcmask (!%p172_p9), 1041408   ;;  %vm731_vm3 = vcmask (!%p172_p9), 31744   ;;  %vm760_vm4 = vcmask (!%p172_p9), 64512   ;;  %vm789_vm5 = vcmask (!%p172_p9), 97280  }
  0x12   : > { %1924 = vmatprep.subr.bf16.mxu0 (!%p172_p9), %v2035_v29  ;;  %1957 = vmatprep.subr.bf16.mxu1 (!%p172_p9), %v2035_v29  ;;  %s2145_s14 = smov (!%p172_p9), 16   ;;  %s2146_s23 = smov (!%p172_p9), 24   ;;  %v1014_v37 = vsel (!%p172_p9), %vm1012_vm2, %v2037_v35, 0  ;;  %vm818_vm6 = vcmask (!%p172_p9), 130048   ;;  %vm847_vm7 = vcmask (!%p172_p9), 162816   ;;  %vm876_vm8 = vcmask (!%p172_p9), 195584  }
  0x13   : > { %vm905_vm9 = vcmask (!%p172_p9), 228352   ;;  %vm934_vm10 = vcmask (!%p172_p9), 261120   ;;  %vm983_vm11 = vcmask (!%p172_p9), 293888   ;;  %s2741_s12 = sand.u32 (!%p172_p9), 1, %s2131_s16   ;;  %s1966_s20 = smul.u32 (!%p172_p9), 1792, %s2199_s19 }
  0x14   : > { %s1964_s13 = smul.u32 (!%p172_p9), 112, %s2741_s12  ;;  %s1594_s29 = scalar_lea.sflag (!%p172_p9), [#allocation3], %s2741_s12 }
  0x15   : > { %1925 = vmatpush3.bf16.msra.mxu0 (!%p172_p9), %v2035_v29  ;;  %1960 = vmatpush3.bf16.msra.mxu1 (!%p172_p9), %v2035_v29 }
  0x16   : > { %1962 = vmatprep.subr.msk.bf16.mxu0 (!%p172_p9), %vm1012_vm2, %v2037_v35  ;;  %1963 = vmatprep.subr.msk.bf16.mxu1 (!%p172_p9), %vm1012_vm2, %v2037_v35 }
  0x17   : > { %s203_s27 = scalar_select %p202_p10, %s2199_s19, 1 }
  0x19   : > { %s1965_s28 = smul.u32 132, %s203_s27  ;;  %1927 = vmatpush3.bf16.msra.mxu0 %v1014_v37  ;;  %1961 = vmatpush3.bf16.msra.mxu1 %v1014_v37  ;;  %s2147_s27 = smov 28  }
  0x1b   : > { %s2231_s5 = scalar_lea.vmem %s2842_s0, %s1965_s28  ;;  %s2148_s28 = smov 32  }
  0x1c   : > { %v2234_v0 = vld [vmem:[%s2231_s5 + $0x10] sm:$0xff]   ;;  %v2237_v1 = vld [vmem:[%s2231_s5 + $0x8] sm:$0xff]   ;;  %v2243_v3 = vld [vmem:[%s2231_s5] sm:$0xff]  }
  0x1d   : > { %522 = vrot.lane.b32.xlu1 %v2234_v0, %s2141_s6  ;;  %v463_v2 = vrot.slane %v2234_v0, 1  ;;  %520 = vrot.lane.b32.xlu0 %v2237_v1, %s2141_s6  ;;  %v461_v4 = vrot.slane %v2237_v1, 1  ;;  %v323_v5 = vshll.u32 %v2237_v1, 16  ;;  %v460_v6 = vrot.slane %v2243_v3, 1  ;;  %v2253_v9 = vld [vmem:[%s2231_s5 + $0x18] sm:$0xff]   ;;  %v2270_v27 = vld [vmem:[%s2231_s5 + $0x20] sm:$0xff]  }
  0x1e   : > { %v316_v7 = vshrl.u32 %v2243_v3, 16  ;;  %v318_v8 = vshll.u32 %v2243_v3, 16  ;;  %v327_v10 = vshrl.u32 %v2237_v1, 16  ;;  %v331_v12 = vshll.u32 %v2234_v0, 16  ;;  %v2300_v40 = vld [vmem:[%s2231_s5 + $0x28] sm:$0xff]   ;;  %v2315_v47 = vld [vmem:[%s2231_s5 + $0x30] sm:$0xff]  }
  0x1f   : > { %v464_v11 = vsel %vm459_vm0, %v461_v4, %v463_v2  ;;  %v462_v13 = vsel %vm459_vm0, %v460_v6, %v461_v4  ;;  %v325_v15 = vrot.slane %v323_v5, 1  ;;  %v465_v16 = vrot.slane %v2253_v9, 1  ;;  %v2336_v56 = vld [vmem:[%s2231_s5 + $0x38] sm:$0xff]   ;;  %v2351_v63 = vld [vmem:[%s2231_s5 + $0x40] sm:$0xff]  }
  0x20   : > { %v320_v14 = vrot.slane %v318_v8, 1  ;;  %v335_v17 = vshrl.u32 %v2234_v0, 16  ;;  %v333_v20 = vrot.slane %v331_v12, 1  ;;  %v339_v21 = vshll.u32 %v2253_v9, 16  ;;  %v2372_v12 = vld [vmem:[%s2231_s5 + $0x48] sm:$0xff]  }
  0x21   : > { %596 = vrot.lane.b32.xlu0 %v464_v11, %s2142_s7  ;;  %489 = vrot.lane.b32.xlu1 %v462_v13, %s2143_s8  ;;  %v329_v19 = vor.u32 %v327_v10, %v325_v15  ;;  %v466_v23 = vsel %vm459_vm0, %v463_v2, %v465_v16  ;;  %v343_v31 = vshrl.u32 %v2253_v9, 16  ;;  %v347_v32 = vshll.u32 %v2270_v27, 16 }
  0x22   : > { %v321_v18 = vor.u32 %v320_v14, %v316_v7  ;;  %v337_v25 = vor.u32 %v335_v17, %v333_v20  ;;  %v341_v26 = vrot.slane %v339_v21, 1  ;;  %v467_v38 = vrot.slane %v2270_v27, 1 }
  0x23   : > { %v334_v24 = vsel %vm314_vm1, %v329_v19, %v333_v20  ;;  %v349_v34 = vrot.slane %v347_v32, 1  ;;  %v351_v41 = vshrl.u32 %v2270_v27, 16  ;;  %v355_v42 = vshll.u32 %v2300_v40, 16  ;;  %v2387_v20 = vld [vmem:[%s2231_s5 + $0x50] sm:$0xff]  }
  0x24   : > { %v326_v22 = vsel %vm314_vm1, %v321_v18, %v325_v15  ;;  %v342_v30 = vsel %vm314_vm1, %v337_v25, %v341_v26  ;;  %v345_v33 = vor.u32 %v343_v31, %v341_v26  ;;  %v468_v39 = vsel %vm459_vm0, %v465_v16, %v467_v38 }
  0x25   : > { %491 = vrot.lane.b32.xlu1 %v464_v11, %s2143_s8  ;;  %431 = vrot.lane.b32.xlu0 %v326_v22, %s2144_s9  ;;  %v353_v43 = vor.u32 %v351_v41, %v349_v34  ;;  %v357_v44 = vrot.slane %v355_v42, 1  ;;  %v469_v46 = vrot.slane %v2300_v40, 1  ;;  %v359_v49 = vshrl.u32 %v2300_v40, 16 }
  0x26   : > { %v350_v36 = vsel %vm314_vm1, %v345_v33, %v349_v34  ;;  %v363_v50 = vshll.u32 %v2315_v47, 16  ;;  %v471_v54 = vrot.slane %v2315_v47, 1  ;;  %v367_v57 = vshrl.u32 %v2315_v47, 16 }
  0x27   : > { %v358_v45 = vsel %vm314_vm1, %v353_v43, %v357_v44  ;;  %v470_v48 = vsel %vm459_vm0, %v467_v38, %v469_v46  ;;  %v361_v51 = vor.u32 %v359_v49, %v357_v44  ;;  %v371_v58 = vshll.u32 %v2336_v56, 16 }
  0x28   : > { %v365_v52 = vrot.slane %v363_v50, 1  ;;  %v472_v55 = vsel %vm459_vm0, %v469_v46, %v471_v54  ;;  %v473_v62 = vrot.slane %v2336_v56, 1  ;;  %v375_v4 = vshrl.u32 %v2336_v56, 16 }
  0x29   : > { %598 = vrot.lane.b32.xlu1 %v466_v23, %s2142_s7  ;;  %433 = vrot.lane.b32.xlu0 %v334_v24, %s2144_s9  ;;  %v373_v60 = vrot.slane %v371_v58, 1  ;;  %v379_v5 = vshll.u32 %v2351_v63, 16  ;;  %v475_v10 = vrot.slane %v2351_v63, 1  ;;  %v383_v13 = vshrl.u32 %v2351_v63, 16 }
  0x2a   : > { %v366_v53 = vsel %vm314_vm1, %v361_v51, %v365_v52  ;;  %v369_v59 = vor.u32 %v367_v57, %v365_v52  ;;  %v474_v2 = vsel %vm459_vm0, %v471_v54, %v473_v62  ;;  %v387_v14 = vshll.u32 %v2372_v12, 16 }
  0x2b   : > { %v377_v6 = vor.u32 %v375_v4, %v373_v60  ;;  %v381_v7 = vrot.slane %v379_v5, 1  ;;  %v476_v11 = vsel %vm459_vm0, %v473_v62, %v475_v10  ;;  %v2149_v17 = vmov 0  }
  0x2c   : > { %v374_v61 = vsel %vm314_vm1, %v369_v59, %v373_v60  ;;  %v389_v16 = vrot.slane %v387_v14, 1  ;;  %2022 = vset.pattern.permute.xlu1 %v2149_v17  ;;  %2021 = vset.pattern.permute.xlu0 %v2149_v17  ;;  %v477_v19 = vrot.slane %v2372_v12, 1  ;;  %v391_v22 = vshrl.u32 %v2372_v12, 16 }
  0x2d   : > { %566 = vrot.lane.b32.xlu1 %v342_v30, %s2145_s14  ;;  %564 = vrot.lane.b32.xlu0 %v334_v24, %s2145_s14  ;;  %v382_v8 = vsel %vm314_vm1, %v377_v6, %v381_v7  ;;  %v385_v15 = vor.u32 %v383_v13, %v381_v7  ;;  %v479_v32 = vrot.slane %v2387_v20, 1 }
  0x2e   : > { %v478_v21 = vsel %vm459_vm0, %v475_v10, %v477_v19  ;;  %v393_v25 = vor.u32 %v391_v22, %v389_v16 }
  0x2f   : > { %v390_v18 = vsel %vm314_vm1, %v385_v15, %v389_v16  ;;  %v480_v35 = vsel %vm459_vm0, %v477_v19, %v479_v32 }
  0x31   : > { %629 = vrot.lane.b32.xlu1 %v2253_v9, %s2146_s23  ;;  %627 = vrot.lane.b32.xlu0 %v2234_v0, %s2146_s23 }
  0x35   : > { %673 = vrot.lane.b32.xlu1 %v350_v36, %s2147_s27  ;;  %671 = vrot.lane.b32.xlu0 %v342_v30, %s2147_s27 }
  0x39   : > { %435 = vrot.lane.b32.xlu1 %v342_v30, %s2144_s9  ;;  %703 = vrot.lane.b32.xlu0 %v466_v23, %s2148_s28 }
  0x3d   : > { %437 = vrot.lane.b32.xlu1 %v350_v36, %s2144_s9  ;;  %705 = vrot.lane.b32.xlu0 %v468_v39, %s2148_s28 }
  0x41   : > { %495 = vrot.lane.b32.xlu1 %v468_v39, %s2143_s8  ;;  %493 = vrot.lane.b32.xlu0 %v466_v23, %s2143_s8  ;;  %v395_v23 = vshll.u32 %v2387_v20, 16 }
  0x43   : > { %v397_v26 = vrot.slane %v395_v23, 1 }
  0x45   : > { %526 = vrot.lane.b32.xlu1 %v2270_v27, %s2141_s6  ;;  %524 = vrot.lane.b32.xlu0 %v2253_v9, %s2141_s6  ;;  %v398_v29 = vsel %vm314_vm1, %v393_v25, %v397_v26 }
  0x49   : > { %570 = vrot.lane.b32.xlu1 %v358_v45, %s2145_s14  ;;  %568 = vrot.lane.b32.xlu0 %v350_v36, %s2145_s14  ;;  %v2408_v36 = vld [vmem:[%s2231_s5 + $0x58] sm:$0xff]  }
  0x4a   : > { %v403_v41 = vshll.u32 %v2408_v36, 16  ;;  %v481_v54 = vrot.slane %v2408_v36, 1 }
  0x4c   : > { %v405_v49 = vrot.slane %v403_v41, 1  ;;  %v482_v4 = vsel %vm459_vm0, %v479_v32, %v481_v54 }
  0x4d   : > { %602 = vrot.lane.b32.xlu1 %v470_v48, %s2142_s7  ;;  %600 = vrot.lane.b32.xlu0 %v468_v39, %s2142_s7  ;;  %v399_v39 = vshrl.u32 %v2387_v20, 16 }
  0x51   : > { %633 = vrot.lane.b32.xlu1 %v2300_v40, %s2146_s23  ;;  %631 = vrot.lane.b32.xlu0 %v2270_v27, %s2146_s23 }
  0x55   : > { %677 = vrot.lane.b32.xlu1 %v366_v53, %s2147_s27  ;;  %675 = vrot.lane.b32.xlu0 %v358_v45, %s2147_s27 }
  0x59   : > { %439 = vrot.lane.b32.xlu1 %v358_v45, %s2144_s9  ;;  %707 = vrot.lane.b32.xlu0 %v470_v48, %s2148_s28 }
  0x5d   : > { %441 = vrot.lane.b32.xlu1 %v366_v53, %s2144_s9  ;;  %709 = vrot.lane.b32.xlu0 %v472_v55, %s2148_s28 }
  0x61   : > { %499 = vrot.lane.b32.xlu1 %v472_v55, %s2143_s8  ;;  %497 = vrot.lane.b32.xlu0 %v470_v48, %s2143_s8  ;;  %v401_v48 = vor.u32 %v399_v39, %v397_v26 }
  0x65   : > { %530 = vrot.lane.b32.xlu1 %v2315_v47, %s2141_s6  ;;  %528 = vrot.lane.b32.xlu0 %v2300_v40, %s2141_s6 }
  0x69   : > { %574 = vrot.lane.b32.xlu1 %v374_v61, %s2145_s14  ;;  %572 = vrot.lane.b32.xlu0 %v366_v53, %s2145_s14  ;;  %v406_v53 = vsel %vm314_vm1, %v401_v48, %v405_v49 }
  0x6d   : > { %606 = vrot.lane.b32.xlu1 %v474_v2, %s2142_s7  ;;  %604 = vrot.lane.b32.xlu0 %v472_v55, %s2142_s7  ;;  %v2431_v55 = vld [vmem:[%s2231_s5 + $0x60] sm:$0xff]  }
  0x6e   : > { %v411_v5 = vshll.u32 %v2431_v55, 16  ;;  %v415_v32 = vshrl.u32 %v2431_v55, 16 }
  0x70   : > { %v413_v15 = vrot.slane %v411_v5, 1 }
  0x71   : > { %637 = vrot.lane.b32.xlu1 %v2336_v56, %s2146_s23  ;;  %635 = vrot.lane.b32.xlu0 %v2315_v47, %s2146_s23 }
  0x75   : > { %681 = vrot.lane.b32.xlu1 %v382_v8, %s2147_s27  ;;  %679 = vrot.lane.b32.xlu0 %v374_v61, %s2147_s27 }
  0x79   : > { %443 = vrot.lane.b32.xlu1 %v374_v61, %s2144_s9  ;;  %711 = vrot.lane.b32.xlu0 %v474_v2, %s2148_s28  ;;  %v407_v61 = vshrl.u32 %v2408_v36, 16 }
  0x7b   : > { %v409_v14 = vor.u32 %v407_v61, %v405_v49 }
  0x7d   : > { %445 = vrot.lane.b32.xlu1 %v382_v8, %s2144_s9  ;;  %713 = vrot.lane.b32.xlu0 %v476_v11, %s2148_s28 }
  0x81   : > { %503 = vrot.lane.b32.xlu1 %v476_v11, %s2143_s8  ;;  %501 = vrot.lane.b32.xlu0 %v474_v2, %s2143_s8 }
  0x85   : > { %534 = vrot.lane.b32.xlu1 %v2351_v63, %s2141_s6  ;;  %532 = vrot.lane.b32.xlu0 %v2336_v56, %s2141_s6 }
  0x89   : > { %578 = vrot.lane.b32.xlu1 %v390_v18, %s2145_s14  ;;  %576 = vrot.lane.b32.xlu0 %v382_v8, %s2145_s14 }
  0x8d   : > { %610 = vrot.lane.b32.xlu1 %v478_v21, %s2142_s7  ;;  %608 = vrot.lane.b32.xlu0 %v476_v11, %s2142_s7 }
  0x8f   : > { %v523_v24 = vpop.permute.xlu1 %522  ;;  %v521_v28 = vpop.permute.xlu0 %520 }
  0x91   : > { %641 = vrot.lane.b32.xlu1 %v2372_v12, %s2146_s23  ;;  %639 = vrot.lane.b32.xlu0 %v2351_v63, %s2146_s23 }
  0x93   : > { %v597_v30 = vpop.permute.xlu0 %596  ;;  %v490_v31 = vpop.permute.xlu1 %489 }
  0x95   : > { %685 = vrot.lane.b32.xlu1 %v398_v29, %s2147_s27  ;;  %683 = vrot.lane.b32.xlu0 %v390_v18, %s2147_s27 }
  0x97   : > { %v492_v33 = vpop.permute.xlu1 %491  ;;  %v432_v34 = vpop.permute.xlu0 %431 }
  0x98   : > { %v733_v42 = vsel %vm731_vm3, %v2243_v3, %v432_v34 }
  0x99   : > { %447 = vrot.lane.b32.xlu1 %v390_v18, %s2144_s9  ;;  %715 = vrot.lane.b32.xlu0 %v478_v21, %s2148_s28  ;;  %v762_v46 = vsel %vm760_vm4, %v733_v42, %v490_v31  ;;  %v236_v42 = vld [vmem:[%s2231_s5 + $0x70] sm:$0xf] }
  0x9a   : > { %v791_v52 = vsel %vm789_vm5, %v762_v46, %v521_v28 }
  0x9b   : > { %v599_v37 = vpop.permute.xlu1 %598  ;;  %v434_v38 = vpop.permute.xlu0 %433 }
  0x9c   : > { %v735_v45 = vsel %vm731_vm3, %v2237_v1, %v434_v38 }
  0x9d   : > { %449 = vrot.lane.b32.xlu1 %v398_v29, %s2144_s9  ;;  %717 = vrot.lane.b32.xlu0 %v480_v35, %s2148_s28  ;;  %v764_v3 = vsel %vm760_vm4, %v735_v45, %v492_v33 }
  0x9e   : > { %v793_v57 = vsel %vm789_vm5, %v764_v3, %v523_v24  ;;  %v483_v24 = vrot.slane %v2431_v55, 1 }
  0x9f   : > { %v567_v43 = vpop.permute.xlu1 %566  ;;  %v565_v44 = vpop.permute.xlu0 %564 }
  0xa0   : > { %v820_v1 = vsel %vm818_vm6, %v791_v52, %v565_v44  ;;  %v822_v62 = vsel %vm818_vm6, %v793_v57, %v567_v43  ;;  %v484_v28 = vsel %vm459_vm0, %v481_v54, %v483_v24  ;;  %v237_v43 = vld [vmem:[%s2231_s5 + $0x74] sm:$0xf] }
  0xa1   : > { %507 = vrot.lane.b32.xlu1 %v480_v35, %s2143_s8  ;;  %505 = vrot.lane.b32.xlu0 %v478_v21, %s2143_s8  ;;  %v849_v60 = vsel %vm847_vm7, %v820_v1, %v597_v30  ;;  %v851_v11 = vsel %vm847_vm7, %v822_v62, %v599_v37  ;;  %v414_v21 = vsel %vm314_vm1, %v409_v14, %v413_v15 }
  0xa2   : > { %v417_v37 = vor.u32 %v415_v32, %v413_v15  ;;  %v2483_v49 = vcombine.low %v236_v42, %v237_v43 }
  0xa3   : > { %v630_v50 = vpop.permute.xlu1 %629  ;;  %v628_v51 = vpop.permute.xlu0 %627 }
  0xa4   : > { %v878_v2 = vsel %vm876_vm8, %v849_v60, %v628_v51  ;;  %v880_v13 = vsel %vm876_vm8, %v851_v11, %v630_v50 }
  0xa5   : > { %538 = vrot.lane.b32.xlu1 %v2387_v20, %s2141_s6  ;;  %536 = vrot.lane.b32.xlu0 %v2372_v12, %s2141_s6 }
  0xa7   : > { %v674_v58 = vpop.permute.xlu1 %673  ;;  %v672_v59 = vpop.permute.xlu0 %671 }
  0xa8   : > { %v907_v6 = vsel %vm905_vm9, %v878_v2, %v672_v59  ;;  %v909_v16 = vsel %vm905_vm9, %v880_v13, %v674_v58  ;;  %v552_v59 = vshll.u32 %v2483_v49, 16 }
  0xa9   : > { %582 = vrot.lane.b32.xlu1 %v406_v53, %s2145_s14  ;;  %580 = vrot.lane.b32.xlu0 %v398_v29, %s2145_s14  ;;  %v2464_v29 = vld [vmem:[%s2231_s5 + $0x68] sm:$0xff]  }
  0xaa   : > { %v419_v33 = vshll.u32 %v2464_v29, 16  ;;  %v485_v45 = vrot.slane %v2464_v29, 1  ;;  %v423_v58 = vshrl.u32 %v2464_v29, 16 }
  0xab   : > { %v436_v7 = vpop.permute.xlu1 %435  ;;  %v704_v8 = vpop.permute.xlu0 %703 }
  0xac   : > { %v936_v10 = vsel %vm934_vm10, %v907_v6, %v704_v8  ;;  %v421_v38 = vrot.slane %v419_v33, 1  ;;  %v737_v44 = vsel %vm731_vm3, %v2234_v0, %v436_v7  ;;  %v554_v8 = vrot.slane %v552_v59, 1 }
  0xad   : > { %614 = vrot.lane.b32.xlu1 %v482_v4, %s2142_s7  ;;  %612 = vrot.lane.b32.xlu0 %v480_v35, %s2142_s7 }
  0xae   : > { %1928 = vmatprep.mubr.msk.bf16.mxu0 %vm983_vm11, %v936_v10  ;;  %v422_v48 = vsel %vm314_vm1, %v417_v37, %v421_v38  ;;  %v425_v7 = vor.u32 %v423_v58, %v421_v38  ;;  %v1739_v10 = vcombine.low %v236_v42, %v236_v42  ;;  %v239_v38 = vld [vmem:[%s2231_s5 + $0x7c] sm:$0xf] }
  0xaf   : > { %v438_v17 = vpop.permute.xlu1 %437  ;;  %v706_v18 = vpop.permute.xlu0 %705 }
  0xb0   : > { %v938_v19 = vsel %vm934_vm10, %v909_v16, %v706_v18  ;;  %v739_v52 = vsel %vm731_vm3, %v2253_v9, %v438_v17  ;;  %v555_v16 = vsel %vm314_vm1, %v425_v7, %v554_v8  ;;  %v427_v17 = vshll.u32 %v1739_v10, 16 }
  0xb1   : > { %645 = vrot.lane.b32.xlu1 %v2408_v36, %s2146_s23  ;;  %643 = vrot.lane.b32.xlu0 %v2387_v20, %s2146_s23 }
  0xb2   : > { %1929 = vmatmul.mubr.msk.bf16.vlgmr.msra.gmra.mrb[0].mxu0 %vm983_vm11, %v938_v19 }
  0xb3   : > { %v496_v22 = vpop.permute.xlu1 %495  ;;  %v494_v23 = vpop.permute.xlu0 %493 }
  0xb4   : > { %v766_v46 = vsel %vm760_vm4, %v737_v44, %v494_v23  ;;  %v768_v54 = vsel %vm760_vm4, %v739_v52, %v496_v22  ;;  %v2517_v22 = vrot.slane %v2483_v49, 1  ;;  %v2044_v52 = vld [vmem:[%s2231_s5 + $0x80] ss:$0 sps:$4 sm:$0x11]  }
  0xb5   : > { %689 = vrot.lane.b32.xlu1 %v414_v21, %s2147_s27  ;;  %687 = vrot.lane.b32.xlu0 %v406_v53, %s2147_s27 }
  0xb7   : > { %v527_v25 = vpop.permute.xlu1 %526  ;;  %v525_v26 = vpop.permute.xlu0 %524 }
  0xb8   : > { %v795_v50 = vsel %vm789_vm5, %v766_v46, %v525_v26  ;;  %v797_v60 = vsel %vm789_vm5, %v768_v54, %v527_v25  ;;  %v238_v25 = vld [vmem:[%s2231_s5 + $0x78] sm:$0xf]  ;;  %s2150_s5 = smov [#allocation2]  }
  0xb9   : > { %451 = vrot.lane.b32.xlu1 %v406_v53, %s2144_s9  ;;  %719 = vrot.lane.b32.xlu0 %v482_v4, %s2148_s28  ;;  %v486_v53 = vsel %vm459_vm0, %v483_v24, %v485_v45  ;;  %v1742_v42 = vcombine.low %v238_v25, %v239_v38 }
  0xbb   : > { %v571_v30 = vpop.permute.xlu1 %570  ;;  %v569_v31 = vpop.permute.xlu0 %568 }
  0xbc   : > { %v824_v0 = vsel %vm818_vm6, %v795_v50, %v569_v31  ;;  %v826_v2 = vsel %vm818_vm6, %v797_v60, %v571_v30  ;;  %v487_v30 = vrot.slane %v1739_v10, 1  ;;  %v1741_v31 = vcombine.low %v238_v25, %v238_v25 }
  0xbd   : > { %453 = vrot.lane.b32.xlu1 %v414_v21, %s2144_s9  ;;  %721 = vrot.lane.b32.xlu0 %v484_v28, %s2148_s28 }
  0xbe   : > { %v560_v37 = vshll.u32 %v1741_v31, 16 }
  0xbf   : > { %v603_v34 = vpop.permute.xlu1 %602  ;;  %v601_v35 = vpop.permute.xlu0 %600 }
  0xc0   : > { %v853_v1 = vsel %vm847_vm7, %v824_v0, %v601_v35  ;;  %v855_v5 = vsel %vm847_vm7, %v826_v2, %v603_v34  ;;  %v488_v34 = vsel %vm459_vm0, %v485_v45, %v487_v30  ;;  %v556_v35 = vshrl.u32 %v2483_v49, 16 }
  0xc1   : > { %511 = vrot.lane.b32.xlu1 %v484_v28, %s2143_s8  ;;  %509 = vrot.lane.b32.xlu0 %v482_v4, %s2143_s8  ;;  %v562_v44 = vrot.slane %v560_v37, 1  ;;  %v667_v2 = vshll.u32 %v2044_v52, 16  ;;  %v1164_v37 = vld [vmem:[%s2844_s2 + $0x18] sm:$0xff] }
  0xc2   : > { %v558_v43 = vor.u32 %v556_v35, %v554_v8 }
  0xc3   : > { %v634_v39 = vpop.permute.xlu1 %633  ;;  %v632_v41 = vpop.permute.xlu0 %631 }
  0xc4   : > { %v882_v57 = vsel %vm876_vm8, %v853_v1, %v632_v41  ;;  %v884_v6 = vsel %vm876_vm8, %v855_v5, %v634_v39  ;;  %v563_v0 = vsel %vm314_vm1, %v558_v43, %v562_v44 }
  0xc5   : > { %542 = vrot.lane.b32.xlu1 %v2431_v55, %s2141_s6  ;;  %540 = vrot.lane.b32.xlu0 %v2408_v36, %s2141_s6 }
  0xc7   : > { %v678_v51 = vpop.permute.xlu1 %677  ;;  %v676_v3 = vpop.permute.xlu0 %675 }
  0xc8   : > { %v911_v9 = vsel %vm905_vm9, %v882_v57, %v676_v3  ;;  %v913_v11 = vsel %vm905_vm9, %v884_v6, %v678_v51  ;;  %v659_v51 = vshll.u32 %v1742_v42, 16 }
  0xc9   : > { %586 = vrot.lane.b32.xlu1 %v422_v48, %s2145_s14  ;;  %584 = vrot.lane.b32.xlu0 %v414_v21, %s2145_s14  ;;  %v429_v21 = vrot.slane %v427_v17, 1 }
  0xca   : > { %v661_v60 = vrot.slane %v659_v51, 1 }
  0xcb   : > { %v440_v61 = vpop.permute.xlu1 %439  ;;  %v708_v62 = vpop.permute.xlu0 %707  ;;  %v430_v26 = vsel %vm314_vm1, %v425_v7, %v429_v21 }
  0xcc   : > { %v940_v4 = vsel %vm934_vm10, %v911_v9, %v708_v62  ;;  %v741_v50 = vsel %vm731_vm3, %v2270_v27, %v440_v61  ;;  %v663_v62 = vshrl.u32 %v1742_v42, 16  ;;  %v662_v21 = vsel %vm314_vm1, %v558_v43, %v661_v60 }
  0xcd   : > { %618 = vrot.lane.b32.xlu1 %v486_v53, %s2142_s7  ;;  %616 = vrot.lane.b32.xlu0 %v484_v28, %s2142_s7  ;;  %v593_v28 = vsel %vm459_vm0, %v485_v45, %v2517_v22  ;;  %v594_v45 = vrot.slane %v1741_v31, 1 }
  0xce   : > { %1932 = vmatprep.mubr.msk.bf16.mxu0 %vm983_vm11, %v940_v4 }
  0xcf   : > { %v442_v13 = vpop.permute.xlu1 %441  ;;  %v710_v14 = vpop.permute.xlu0 %709  ;;  %v595_v59 = vsel %vm459_vm0, %v2517_v22, %v594_v45  ;;  %v1168_v45 = vld [vmem:[%s2844_s2 + $0x38] sm:$0xff] }
  0xd0   : > { %v942_v15 = vsel %vm934_vm10, %v913_v11, %v710_v14  ;;  %v743_v27 = vsel %vm731_vm3, %v2300_v40, %v442_v13  ;;  %v665_v13 = vor.u32 %v663_v62, %v661_v60  ;;  %v669_v14 = vrot.slane %v667_v2, 1 }
  0xd1   : > { %649 = vrot.lane.b32.xlu1 %v2464_v29, %s2146_s23  ;;  %647 = vrot.lane.b32.xlu0 %v2431_v55, %s2146_s23 }
  0xd2   : > { %1933 = vmatmul.mubr.msk.bf16.gmra.mrb[4].mxu0 %vm983_vm11, %v942_v15 }
  0xd3   : > { %v500_v18 = vpop.permute.xlu1 %499  ;;  %v498_v19 = vpop.permute.xlu0 %497 }
  0xd4   : > { %v770_v3 = vsel %vm760_vm4, %v741_v50, %v498_v19  ;;  %v772_v9 = vsel %vm760_vm4, %v743_v27, %v500_v18  ;;  %v670_v19 = vsel %vm314_vm1, %v665_v13, %v669_v14  ;;  %v1167_v50 = vld [vmem:[%s2844_s2 + $0x30] sm:$0xff]  ;;  %v1174_v14 = vld [vmem:[%s2844_s2 + $0x68] sm:$0xff] }
  0xd5   : > { %693 = vrot.lane.b32.xlu1 %v555_v16, %s2147_s27  ;;  %691 = vrot.lane.b32.xlu0 %v422_v48, %s2147_s27 }
  0xd7   : > { %v531_v23 = vpop.permute.xlu1 %530  ;;  %v529_v24 = vpop.permute.xlu0 %528 }
  0xd8   : > { %v799_v1 = vsel %vm789_vm5, %v770_v3, %v529_v24  ;;  %v801_v4 = vsel %vm789_vm5, %v772_v9, %v531_v23  ;;  %v699_v23 = vrot.slane %v1742_v42, 1  ;;  %v701_v24 = vrot.slane %v2044_v52, 1 }
  0xd9   : > { %455 = vrot.lane.b32.xlu1 %v422_v48, %s2144_s9  ;;  %723 = vrot.lane.b32.xlu0 %v486_v53, %s2148_s28 }
  0xda   : > { %v700_v30 = vsel %vm459_vm0, %v2517_v22, %v699_v23  ;;  %v1163_v22 = vld [vmem:[%s2844_s2 + $0x10] sm:$0xff] }
  0xdb   : > { %v575_v32 = vpop.permute.xlu1 %574  ;;  %v573_v33 = vpop.permute.xlu0 %572 }
  0xdc   : > { %v828_v57 = vsel %vm818_vm6, %v799_v1, %v573_v33  ;;  %v830_v7 = vsel %vm818_vm6, %v801_v4, %v575_v32  ;;  %v1162_v32 = vld [vmem:[%s2844_s2 + $0x8] sm:$0xff]  ;;  %v1161_v33 = vld [vmem:[%s2844_s2] sm:$0xff]  ;;  %v1171_v4 = vld [vmem:[%s2844_s2 + $0x50] sm:$0xff] }
  0xdd   : > { %457 = vrot.lane.b32.xlu1 %v430_v26, %s2144_s9  ;;  %725 = vrot.lane.b32.xlu0 %v593_v28, %s2148_s28 }
  0xdf   : > { %v607_v39 = vpop.permute.xlu1 %606  ;;  %v605_v41 = vpop.permute.xlu0 %604 }
  0xe0   : > { %v857_v58 = vsel %vm847_vm7, %v828_v57, %v605_v41  ;;  %v859_v10 = vsel %vm847_vm7, %v830_v7, %v607_v39  ;;  %v1165_v41 = vld [vmem:[%s2844_s2 + $0x20] sm:$0xff]  ;;  %v1172_v7 = vld [vmem:[%s2844_s2 + $0x58] sm:$0xff] }
  0xe1   : > { %515 = vrot.lane.b32.xlu1 %v488_v34, %s2143_s8  ;;  %513 = vrot.lane.b32.xlu0 %v486_v53, %s2143_s8  ;;  %v1169_v57 = vld [vmem:[%s2844_s2 + $0x40] sm:$0xff] }
  0xe3   : > { %v638_v46 = vpop.permute.xlu1 %637  ;;  %v636_v48 = vpop.permute.xlu0 %635 }
  0xe4   : > { %v886_v61 = vsel %vm876_vm8, %v857_v58, %v636_v48  ;;  %v888_v11 = vsel %vm876_vm8, %v859_v10, %v638_v46  ;;  %v1173_v10 = vld [vmem:[%s2844_s2 + $0x60] sm:$0xff] }
  0xe5   : > { %546 = vrot.lane.b32.xlu1 %v2483_v49, %s2141_s6  ;;  %544 = vrot.lane.b32.xlu0 %v2464_v29, %s2141_s6  ;;  %s2049_s6 = sshll.u32 %s2150_s5, 4  ;;  %s2050_s6 = int_to_ptr.vmem [resolvable:$false] %s2049_s6 }
  0xe7   : > { %v682_v53 = vpop.permute.xlu1 %681  ;;  %v680_v54 = vpop.permute.xlu0 %679 }
  0xe8   : > { %v915_v40 = vsel %vm905_vm9, %v886_v61, %v680_v54  ;;  %v917_v15 = vsel %vm905_vm9, %v888_v11, %v682_v53 }
  0xe9   : > { %590 = vrot.lane.b32.xlu1 %v563_v0, %s2145_s14  ;;  %588 = vrot.lane.b32.xlu0 %v555_v16, %s2145_s14  ;;  %s2744_s14 = scalar_lea.vmem [#allocation2], %s1964_s13 }
  0xea   : > { %s1612_s22 = sshll.u32 %s2744_s14, 4  ;;  %s2760_s22 = int_to_ptr.vmem [resolvable:$true] %s1612_s22 }
  0xeb   : > { %v444_v5 = vpop.permute.xlu1 %443  ;;  %v712_v6 = vpop.permute.xlu0 %711  ;;  %s2045_s30 = scalar_lea.vmem %s2760_s22, 1792  ;;  %p2052_p0 = scmp.lt.s32.totalorder %s2760_s22, %s2050_s6 }
  0xec   : > { %v944_v8 = vsel %vm934_vm10, %v915_v40, %v712_v6  ;;  %v745_v46 = vsel %vm731_vm3, %v2315_v47, %v444_v5  ;;  %p2046_p11 = scmp.ne.s32.totalorder %s2760_s22, %s2045_s30 }
  0xed   : > { %622 = vrot.lane.b32.xlu1 %v595_v59, %s2142_s7  ;;  %620 = vrot.lane.b32.xlu0 %v593_v28, %s2142_s7  ;;  %v702_v28 = vsel %vm459_vm0, %v699_v23, %v701_v24  ;;  %v1178_v24 = vld [vmem:[%s2844_s2 + $0x88] sm:$0xff]  ;;  %s2051_s7 = scalar_lea.vmem %s2050_s6, 3584 }
  0xee   : > { %1936 = vmatprep.mubr.msk.bf16.mxu0 %vm983_vm11, %v944_v8  ;;  %p2047_p12 = pnand %p2046_p11, %p2216_p5  ;;  %p2053_p1 = scmp.lt.s32.totalorder %s2051_s7, %s2045_s30 }
  0xef   : > { %v446_v16 = vpop.permute.xlu1 %445  ;;  %v714_v17 = vpop.permute.xlu0 %713 }
  0xf0   : > { %v946_v18 = vsel %vm934_vm10, %v917_v15, %v714_v17  ;;  %v747_v47 = vsel %vm731_vm3, %v2336_v56, %v446_v16  ;;  %v1170_v56 = vld [vmem:[%s2844_s2 + $0x48] sm:$0xff]  ;;  %v1175_v15 = vld [vmem:[%s2844_s2 + $0x70] sm:$0xff]  ;;  %p2048_p13 = pneg %p2047_p12  ;;  %p2054_p2 = por %p2053_p1, %p2052_p0 }
  0xf1   : > { %653 = vrot.lane.b32.xlu1 %v1742_v42, %s2146_s23  ;;  %651 = vrot.lane.b32.xlu0 %v2483_v49, %s2146_s23  ;;  %v1166_v42 = vld [vmem:[%s2844_s2 + $0x28] sm:$0xff] }
  0xf2   : > { %1937 = vmatmul.mubr.msk.bf16.gmra.mrb[8].mxu0 %vm983_vm11, %v946_v18  ;;  %v1176_v18 = vld [vmem:[%s2844_s2 + $0x78] sm:$0xff]  ;;  %p2055_p3 = pnand %p2054_p2, %p2048_p13 }
  0xf3   : > { %v504_v25 = vpop.permute.xlu1 %503  ;;  %v502_v26 = vpop.permute.xlu0 %501 }
  0xf4   : > { %v774_v48 = vsel %vm760_vm4, %v745_v46, %v502_v26  ;;  %v776_v53 = vsel %vm760_vm4, %v747_v47, %v504_v25  ;;  %v1179_v25 = vld [vmem:[%s2844_s2 + $0x90] sm:$0xff] }
  0xf5   : > { %697 = vrot.lane.b32.xlu1 %v670_v19, %s2147_s27  ;;  %695 = vrot.lane.b32.xlu0 %v662_v21, %s2147_s27  ;;  %v1177_v19 = vld [vmem:[%s2844_s2 + $0x80] sm:$0xff] }
  0xf7   : > { %v535_v49 = vpop.permute.xlu1 %534  ;;  %v533_v31 = vpop.permute.xlu0 %532 }
  0xf8   : > { %v803_v51 = vsel %vm789_vm5, %v774_v48, %v533_v31  ;;  %v805_v27 = vsel %vm789_vm5, %v776_v53, %v535_v49  ;;  %v1181_v49 = vld [vmem:[%s2844_s2 + $0xa0] sm:$0xff]  ;;  %v1187_v53 = vld [vmem:[%s2844_s2 + $0xd0] sm:$0xff] }
  0xf9   : > { %729 = vrot.lane.b32.xlu1 %v702_v28, %s2148_s28  ;;  %727 = vrot.lane.b32.xlu0 %v700_v30, %s2148_s28  ;;  %v1180_v30 = vld [vmem:[%s2844_s2 + $0x98] sm:$0xff]  ;;  %v1185_v48 = vld [vmem:[%s2844_s2 + $0xc0] sm:$0xff]  ;;  %s2765_s28 = scalar_lea.hbm %s2845_s3, %s1966_s20 }
  0xfb   : > { %v579_v34 = vpop.permute.xlu1 %578  ;;  %v577_v35 = vpop.permute.xlu0 %576 }
  0xfc   : > { %v832_v52 = vsel %vm818_vm6, %v803_v51, %v577_v35  ;;  %v834_v9 = vsel %vm818_vm6, %v805_v27, %v579_v34 }
  0xfd   : > { %1196 = vperm.xlu1 %2022, %v1162_v32   ;;  %1191 = vperm.xlu0 %2021, %v1161_v33   ;;  %v1182_v33 = vld [vmem:[%s2844_s2 + $0xa8] sm:$0xff] }
  0xff   : > { %v611_v38 = vpop.permute.xlu1 %610  ;;  %v609_v39 = vpop.permute.xlu0 %608 }
 0x100   : > { %v861_v1 = vsel %vm847_vm7, %v832_v52, %v609_v39  ;;  %v863_v62 = vsel %vm847_vm7, %v834_v9, %v611_v38 }
 0x101   : > { %1201 = vperm.xlu1 %2022, %v1163_v22   ;;  %1206 = vperm.xlu0 %2021, %v1164_v37   ;;  %v1183_v22 = vld [vmem:[%s2844_s2 + $0xb0] sm:$0xff] }
 0x103   : > { %v642_v43 = vpop.permute.xlu1 %641  ;;  %v640_v44 = vpop.permute.xlu0 %639 }
 0x104   : > { %v890_v54 = vsel %vm876_vm8, %v861_v1, %v640_v44  ;;  %v892_v2 = vsel %vm876_vm8, %v863_v62, %v642_v43 }
 0x105   : > { %1211 = vperm.xlu1 %2022, %v1165_v41   ;;  %1216 = vperm.xlu0 %2021, %v1166_v42   ;;  %v1184_v41 = vld [vmem:[%s2844_s2 + $0xb8] sm:$0xff] }
 0x107   : > { %v686_v3 = vpop.permute.xlu1 %685  ;;  %v684_v0 = vpop.permute.xlu0 %683 }
 0x108   : > { %v919_v58 = vsel %vm905_vm9, %v890_v54, %v684_v0  ;;  %v921_v40 = vsel %vm905_vm9, %v892_v2, %v686_v3 }
 0x109   : > { %1221 = vperm.xlu1 %2022, %v1167_v50   ;;  %1226 = vperm.xlu0 %2021, %v1168_v45  }
 0x10b   : > { %v448_v59 = vpop.permute.xlu1 %447  ;;  %v716_v60 = vpop.permute.xlu0 %715 }
 0x10c   : > { %v948_v61 = vsel %vm934_vm10, %v919_v58, %v716_v60  ;;  %v749_v34 = vsel %vm731_vm3, %v2351_v63, %v448_v59  ;;  %v1188_v58 = vld [vmem:[%s2844_s2 + $0xd8] sm:$0xff] }
 0x10d   : > { %1940 = vmatprep.mubr.msk.bf16.mxu0 %vm983_vm11, %v948_v61  ;;  %1231 = vperm.xlu1 %2022, %v1169_v57  }
 0x10e   : > { %1236 = vperm.xlu0 %2021, %v1170_v56  }
 0x10f   : > { %v450_v5 = vpop.permute.xlu1 %449  ;;  %v718_v6 = vpop.permute.xlu0 %717 }
 0x110   : > { %v950_v8 = vsel %vm934_vm10, %v921_v40, %v718_v6  ;;  %v751_v63 = vsel %vm731_vm3, %v2372_v12, %v450_v5  ;;  %v1186_v12 = vld [vmem:[%s2844_s2 + $0xc8] sm:$0xff] }
 0x111   : > { %1941 = vmatmul.mubr.msk.bf16.gmra.mrb[12].mxu0 %vm983_vm11, %v950_v8  ;;  %1241 = vperm.xlu1 %2022, %v1171_v4  }
 0x112   : > { %1246 = vperm.xlu0 %2021, %v1172_v7  }
 0x113   : > { %v508_v11 = vpop.permute.xlu1 %507  ;;  %v506_v13 = vpop.permute.xlu0 %505 }
 0x114   : > { %v778_v35 = vsel %vm760_vm4, %v749_v34, %v506_v13  ;;  %v780_v44 = vsel %vm760_vm4, %v751_v63, %v508_v11 }
 0x115   : > { %1251 = vperm.xlu1 %2022, %v1173_v10  }
 0x116   : > { %1256 = vperm.xlu0 %2021, %v1174_v14  }
 0x117   : > { %v539_v16 = vpop.permute.xlu1 %538  ;;  %v537_v17 = vpop.permute.xlu0 %536 }
 0x118   : > { %v807_v37 = vsel %vm789_vm5, %v778_v35, %v537_v17  ;;  %v809_v50 = vsel %vm789_vm5, %v780_v44, %v539_v16 }
 0x119   : > { %1261 = vperm.xlu1 %2022, %v1175_v15  }
 0x11a   : > { %1266 = vperm.xlu0 %2021, %v1176_v18  }
 0x11b   : > { %v583_v21 = vpop.permute.xlu1 %582  ;;  %v581_v23 = vpop.permute.xlu0 %580 }
 0x11c   : > { %v836_v42 = vsel %vm818_vm6, %v807_v37, %v581_v23  ;;  %v838_v0 = vsel %vm818_vm6, %v809_v50, %v583_v21 }
 0x11d   : > { %1271 = vperm.xlu1 %2022, %v1177_v19  }
 0x11e   : > { %1276 = vperm.xlu0 %2021, %v1178_v24  }
 0x11f   : > { %v615_v26 = vpop.permute.xlu1 %614  ;;  %v613_v28 = vpop.permute.xlu0 %612 }
 0x120   : > { %v865_v43 = vsel %vm847_vm7, %v836_v42, %v613_v28  ;;  %v867_v47 = vsel %vm847_vm7, %v838_v0, %v615_v26 }
 0x121   : > { %1281 = vperm.xlu1 %2022, %v1179_v25  }
 0x122   : > { %1286 = vperm.xlu0 %2021, %v1180_v30  }
 0x123   : > { %v646_v31 = vpop.permute.xlu1 %645  ;;  %v644_v32 = vpop.permute.xlu0 %643 }
 0x124   : > { %v894_v46 = vsel %vm876_vm8, %v865_v43, %v644_v32  ;;  %v896_v1 = vsel %vm876_vm8, %v867_v47, %v646_v31 }
 0x125   : > { %1291 = vperm.xlu1 %2022, %v1181_v49  }
 0x126   : > { %1296 = vperm.xlu0 %2021, %v1182_v33  }
 0x127   : > { %v690_v38 = vpop.permute.xlu1 %689  ;;  %v688_v39 = vpop.permute.xlu0 %687 }
 0x128   : > { %v923_v45 = vsel %vm905_vm9, %v894_v46, %v688_v39  ;;  %v925_v54 = vsel %vm905_vm9, %v896_v1, %v690_v38 }
 0x129   : > { %1301 = vperm.xlu1 %2022, %v1183_v22  }
 0x12a   : > { %1306 = vperm.xlu0 %2021, %v1184_v41  }
 0x12b   : > { %v452_v51 = vpop.permute.xlu1 %451  ;;  %v720_v3 = vpop.permute.xlu0 %719 }
 0x12c   : > { %v952_v52 = vsel %vm934_vm10, %v923_v45, %v720_v3  ;;  %v753_v7 = vsel %vm731_vm3, %v2387_v20, %v452_v51 }
 0x12d   : > { %1944 = vmatprep.mubr.msk.bf16.mxu1 %vm983_vm11, %v952_v52  ;;  %1311 = vperm.xlu1 %2022, %v1185_v48  }
 0x12e   : > { %1316 = vperm.xlu0 %2021, %v1186_v12  }
 0x12f   : > { %v454_v57 = vpop.permute.xlu1 %453  ;;  %v722_v27 = vpop.permute.xlu0 %721 }
 0x130   : > { %v954_v59 = vsel %vm934_vm10, %v925_v54, %v722_v27  ;;  %v755_v15 = vsel %vm731_vm3, %v2408_v36, %v454_v57 }
 0x131   : > { %1945 = vmatmul.mubr.msk.bf16.vlgmr.msra.gmra.mrb[0].mxu1 %vm983_vm11, %v954_v59  ;;  %1321 = vperm.xlu1 %2022, %v1187_v53  }
 0x132   : > { %1326 = vperm.xlu0 %2021, %v1188_v58  }
 0x133   : > { %v512_v60 = vpop.permute.xlu1 %511  ;;  %v510_v56 = vpop.permute.xlu0 %509 }
 0x134   : > { %v782_v8 = vsel %vm760_vm4, %v753_v7, %v510_v56  ;;  %v784_v17 = vsel %vm760_vm4, %v755_v15, %v512_v60 }
 0x137   : > { %v543_v9 = vpop.permute.xlu1 %542  ;;  %v541_v61 = vpop.permute.xlu0 %540 }
 0x138   : > { %v811_v10 = vsel %vm789_vm5, %v782_v8, %v541_v61  ;;  %v813_v19 = vsel %vm789_vm5, %v784_v17, %v543_v9 }
 0x13b   : > { %v587_v62 = vpop.permute.xlu1 %586  ;;  %v585_v2 = vpop.permute.xlu0 %584 }
 0x13c   : > { %v840_v14 = vsel %vm818_vm6, %v811_v10, %v585_v2  ;;  %v842_v24 = vsel %vm818_vm6, %v813_v19, %v587_v62 }
 0x13f   : > { %v619_v4 = vpop.permute.xlu1 %618  ;;  %v617_v40 = vpop.permute.xlu0 %616 }
 0x140   : > { %v869_v16 = vsel %vm847_vm7, %v840_v14, %v617_v40  ;;  %v871_v26 = vsel %vm847_vm7, %v842_v24, %v619_v4 }
 0x143   : > { %v650_v5 = vpop.permute.xlu1 %649  ;;  %v648_v6 = vpop.permute.xlu0 %647 }
 0x144   : > { %v898_v18 = vsel %vm876_vm8, %v869_v16, %v648_v6  ;;  %v900_v36 = vsel %vm876_vm8, %v871_v26, %v650_v5 }
 0x147   : > { %v694_v11 = vpop.permute.xlu1 %693  ;;  %v692_v13 = vpop.permute.xlu0 %691 }
 0x148   : > { %v927_v20 = vsel %vm905_vm9, %v898_v18, %v692_v13  ;;  %v929_v28 = vsel %vm905_vm9, %v900_v36, %v694_v11 }
 0x14b   : > { %v456_v21 = vpop.permute.xlu1 %455  ;;  %v724_v23 = vpop.permute.xlu0 %723 }
 0x14c   : > { %v956_v25 = vsel %vm934_vm10, %v927_v20, %v724_v23  ;;  %v757_v63 = vsel %vm731_vm3, %v2431_v55, %v456_v21 }
 0x14d   : > { %1948 = vmatprep.mubr.msk.bf16.mxu1 %vm983_vm11, %v956_v25 }
 0x14f   : > { %v458_v30 = vpop.permute.xlu1 %457  ;;  %v726_v49 = vpop.permute.xlu0 %725 }
 0x150   : > { %v958_v31 = vsel %vm934_vm10, %v929_v28, %v726_v49  ;;  %v759_v43 = vsel %vm731_vm3, %v2464_v29, %v458_v30 }
 0x151   : > { %1949 = vmatmul.mubr.msk.bf16.gmra.mrb[4].mxu1 %vm983_vm11, %v958_v31 }
 0x153   : > { %v516_v32 = vpop.permute.xlu1 %515  ;;  %v514_v33 = vpop.permute.xlu0 %513 }
 0x154   : > { %v788_v44 = vsel %vm760_vm4, %v759_v43, %v516_v32  ;;  %v786_v46 = vsel %vm760_vm4, %v757_v63, %v514_v33 }
 0x157   : > { %v547_v34 = vpop.permute.xlu1 %546  ;;  %v545_v35 = vpop.permute.xlu0 %544 }
 0x158   : > { %v817_v48 = vsel %vm789_vm5, %v788_v44, %v547_v34  ;;  %v815_v50 = vsel %vm789_vm5, %v786_v46, %v545_v35 }
 0x15b   : > { %v591_v22 = vpop.permute.xlu1 %590  ;;  %v589_v37 = vpop.permute.xlu0 %588 }
 0x15c   : > { %v846_v3 = vsel %vm818_vm6, %v817_v48, %v591_v22  ;;  %v844_v12 = vsel %vm818_vm6, %v815_v50, %v589_v37 }
 0x15f   : > { %v623_v38 = vpop.permute.xlu1 %622  ;;  %v621_v39 = vpop.permute.xlu0 %620 }
 0x160   : > { %v875_v55 = vsel %vm847_vm7, %v846_v3, %v623_v38  ;;  %v873_v0 = vsel %vm847_vm7, %v844_v12, %v621_v39 }
 0x163   : > { %v654_v41 = vpop.permute.xlu1 %653  ;;  %v652_v42 = vpop.permute.xlu0 %651 }
 0x164   : > { %v904_v29 = vsel %vm876_vm8, %v875_v55, %v654_v41  ;;  %v902_v52 = vsel %vm876_vm8, %v873_v0, %v652_v42 }
 0x167   : > { %v698_v45 = vpop.permute.xlu1 %697  ;;  %v696_v51 = vpop.permute.xlu0 %695 }
 0x168   : > { %v933_v47 = vsel %vm905_vm9, %v904_v29, %v698_v45  ;;  %v931_v1 = vsel %vm905_vm9, %v902_v52, %v696_v51 }
 0x16b   : > { %v730_v53 = vpop.permute.xlu1 %729  ;;  %v728_v54 = vpop.permute.xlu0 %727 }
 0x16c   : > { %v962_v57 = vsel %vm934_vm10, %v933_v47, %v730_v53  ;;  %v960_v27 = vsel %vm934_vm10, %v931_v1, %v728_v54 }
 0x16d   : > { %1952 = vmatprep.mubr.msk.bf16.mxu1 %vm983_vm11, %v960_v27 }
 0x16e   : > { %1953 = vmatmul.mubr.msk.bf16.gmra.mrb[8].mxu1 %vm983_vm11, %v962_v57 }
 0x17c   : > { %v1197_v58 = vpop.permute.xlu1 %1196  ;;  %v1192_v59 = vpop.permute.xlu0 %1191 }
 0x180   : > { %v1202_v60 = vpop.permute.xlu1 %1201  ;;  %v1207_v9 = vpop.permute.xlu0 %1206 }
 0x184   : > { %v1212_v21 = vpop.permute.xlu1 %1211  ;;  %v1217_v23 = vpop.permute.xlu0 %1216 }
 0x185   : > { %v1930_v56 = vpop.f32.mrb[0].mxu0 }
 0x186   : > { %v1050_v61 = vpop.f32.mrb[1].mxu0  ;;  %v1331_v4 = vmul.f32 %v1930_v56, %v1202_v60 }
 0x187   : > { %v1329_v62 = vmul.f32 %v1192_v59, %v1050_v61  ;;  %v1931_v2 = vpop.f32.mrb[2].mxu0 }
 0x188   : > { %v1332_v40 = vmul.f32 %v1931_v2, %v1207_v9  ;;  %v1053_v5 = vpop.f32.mrb[3].mxu0  ;;  %v1533_v14 = vmul.f32 %v1331_v4, %v1331_v4  ;;  %v1222_v24 = vpop.permute.xlu1 %1221 }
 0x189   : > { %v1330_v6 = vmul.f32 %v1197_v58, %v1053_v5  ;;  %v1531_v8 = vmul.f32 %v1329_v62, %v1329_v62  ;;  %v1227_v26 = vpop.permute.xlu0 %1226 }
 0x18a   : > { %v1830_v7 = vpack.c.bf16 %v1332_v40, %v1331_v4  ;;  %v1534_v17 = vmul.f32 %v1332_v40, %v1332_v40 }
 0x18b   : > { %v1825_v10 = vpack.c.bf16 %v1330_v6, %v1329_v62  ;;  %v1497_v11 = vadd.f32 %v1330_v6, %v1329_v62  ;;  %v1532_v13 = vmul.f32 %v1330_v6, %v1330_v6 }
 0x18c   : > { %1892 = vst [vmem:[%s2744_s14 + $0x8] sm:$0xff] %v1830_v7   ;;  %v1232_v45 = vpop.permute.xlu1 %1231 }
 0x18d   : > { %1826 = vst [vmem:[%s2744_s14] sm:$0xff] %v1825_v10   ;;  %v1498_v15 = vadd.f32 %v1497_v11, %v1331_v4  ;;  %v1559_v16 = vadd.f32 %v1532_v13, %v1531_v8  ;;  %v1237_v51 = vpop.permute.xlu0 %1236 }
 0x18f   : > { %v1560_v18 = vadd.f32 %v1559_v16, %v1533_v14  ;;  %v1499_v19 = vadd.f32 %v1498_v15, %v1332_v40 }
 0x190   : > { %v1242_v3 = vpop.permute.xlu1 %1241 }
 0x191   : > { %v1561_v20 = vadd.f32 %v1560_v18, %v1534_v17  ;;  %v1247_v55 = vpop.permute.xlu0 %1246 }
 0x194   : > { %v1252_v7 = vpop.permute.xlu1 %1251 }
 0x195   : > { %v1257_v8 = vpop.permute.xlu0 %1256 }
 0x198   : > { %v1262_v10 = vpop.permute.xlu1 %1261 }
 0x199   : > { %v1267_v13 = vpop.permute.xlu0 %1266 }
 0x1a5   : > { %v1934_v25 = vpop.f32.mrb[4].mxu0 }
 0x1a6   : > { %v1066_v36 = vpop.f32.mrb[5].mxu0  ;;  %v1335_v49 = vmul.f32 %v1934_v25, %v1222_v24 }
 0x1a7   : > { %v1333_v28 = vmul.f32 %v1212_v21, %v1066_v36  ;;  %v1935_v30 = vpop.f32.mrb[6].mxu0 }
 0x1a8   : > { %v1336_v31 = vmul.f32 %v1935_v30, %v1227_v26  ;;  %v1069_v32 = vpop.f32.mrb[7].mxu0  ;;  %v1537_v42 = vmul.f32 %v1335_v49, %v1335_v49 }
 0x1a9   : > { %v1500_v33 = vadd.f32 %v1499_v19, %v1333_v28  ;;  %v1535_v34 = vmul.f32 %v1333_v28, %v1333_v28  ;;  %v1334_v35 = vmul.f32 %v1217_v23, %v1069_v32 }
 0x1aa   : > { %v1840_v22 = vpack.c.bf16 %v1336_v31, %v1335_v49  ;;  %v1538_v44 = vmul.f32 %v1336_v31, %v1336_v31 }
 0x1ab   : > { %v1562_v37 = vadd.f32 %v1561_v20, %v1535_v34  ;;  %v1835_v38 = vpack.c.bf16 %v1334_v35, %v1333_v28  ;;  %v1501_v39 = vadd.f32 %v1500_v33, %v1334_v35  ;;  %v1536_v41 = vmul.f32 %v1334_v35, %v1334_v35 }
 0x1ac   : > { %1894 = vst [vmem:[%s2744_s14 + $0x18] sm:$0xff] %v1840_v22   ;;  %v1272_v22 = vpop.permute.xlu1 %1271 }
 0x1ad   : > { %1893 = vst [vmem:[%s2744_s14 + $0x10] sm:$0xff] %v1835_v38   ;;  %v1502_v63 = vadd.f32 %v1501_v39, %v1335_v49  ;;  %v1563_v43 = vadd.f32 %v1562_v37, %v1536_v41  ;;  %v1277_v37 = vpop.permute.xlu0 %1276 }
 0x1af   : > { %v1564_v46 = vadd.f32 %v1563_v43, %v1537_v42  ;;  %v1503_v48 = vadd.f32 %v1502_v63, %v1336_v31 }
 0x1b0   : > { %v1282_v39 = vpop.permute.xlu1 %1281 }
 0x1b1   : > { %v1565_v50 = vadd.f32 %v1564_v46, %v1538_v44  ;;  %v1287_v42 = vpop.permute.xlu0 %1286 }
 0x1c5   : > { %v1938_v12 = vpop.f32.mrb[8].mxu0 }
 0x1c6   : > { %v1082_v0 = vpop.f32.mrb[9].mxu0  ;;  %v1339_v47 = vmul.f32 %v1938_v12, %v1242_v3 }
 0x1c7   : > { %v1337_v29 = vmul.f32 %v1232_v45, %v1082_v0  ;;  %v1939_v52 = vpop.f32.mrb[10].mxu0 }
 0x1c8   : > { %v1340_v1 = vmul.f32 %v1939_v52, %v1247_v55  ;;  %v1085_v53 = vpop.f32.mrb[11].mxu0  ;;  %v1541_v61 = vmul.f32 %v1339_v47, %v1339_v47 }
 0x1c9   : > { %v1504_v54 = vadd.f32 %v1503_v48, %v1337_v29  ;;  %v1539_v57 = vmul.f32 %v1337_v29, %v1337_v29  ;;  %v1338_v27 = vmul.f32 %v1237_v51, %v1085_v53 }
 0x1ca   : > { %v1850_v58 = vpack.c.bf16 %v1340_v1, %v1339_v47  ;;  %v1542_v4 = vmul.f32 %v1340_v1, %v1340_v1 }
 0x1cb   : > { %v1566_v59 = vadd.f32 %v1565_v50, %v1539_v57  ;;  %v1845_v60 = vpack.c.bf16 %v1338_v27, %v1337_v29  ;;  %v1505_v56 = vadd.f32 %v1504_v54, %v1338_v27  ;;  %v1540_v9 = vmul.f32 %v1338_v27, %v1338_v27 }
 0x1cc   : > { %1896 = vst [vmem:[%s2744_s14 + $0x28] sm:$0xff] %v1850_v58   ;;  %v1292_v58 = vpop.permute.xlu1 %1291 }
 0x1cd   : > { %1895 = vst [vmem:[%s2744_s14 + $0x20] sm:$0xff] %v1845_v60   ;;  %v1506_v62 = vadd.f32 %v1505_v56, %v1339_v47  ;;  %v1567_v2 = vadd.f32 %v1566_v59, %v1540_v9  ;;  %v1297_v59 = vpop.permute.xlu0 %1296 }
 0x1cf   : > { %v1568_v40 = vadd.f32 %v1567_v2, %v1541_v61  ;;  %v1507_v5 = vadd.f32 %v1506_v62, %v1340_v1 }
 0x1d0   : > { %v1302_v56 = vpop.permute.xlu1 %1301 }
 0x1d1   : > { %v1569_v6 = vadd.f32 %v1568_v40, %v1542_v4  ;;  %v1307_v61 = vpop.permute.xlu0 %1306 }
 0x1e4   : > { %v1942_v11 = vpop.f32.mrb[12].mxu0 }
 0x1e5   : > { %v1098_v14 = vpop.f32.mrb[13].mxu0  ;;  %v1343_v17 = vmul.f32 %v1942_v11, %v1262_v10 }
 0x1e6   : > { %v1341_v15 = vmul.f32 %v1252_v7, %v1098_v14  ;;  %v1943_v16 = vpop.f32.mrb[14].mxu0 }
 0x1e7   : > { %v1344_v18 = vmul.f32 %v1943_v16, %v1267_v13  ;;  %v1101_v19 = vpop.f32.mrb[15].mxu0  ;;  %v1545_v30 = vmul.f32 %v1343_v17, %v1343_v17 }
 0x1e8   : > { %v1508_v20 = vadd.f32 %v1507_v5, %v1341_v15  ;;  %v1543_v21 = vmul.f32 %v1341_v15, %v1341_v15  ;;  %v1342_v23 = vmul.f32 %v1257_v8, %v1101_v19 }
 0x1e9   : > { %v1860_v24 = vpack.c.bf16 %v1344_v18, %v1343_v17  ;;  %v1546_v32 = vmul.f32 %v1344_v18, %v1344_v18 }
 0x1ea   : > { %v1570_v25 = vadd.f32 %v1569_v6, %v1543_v21  ;;  %v1855_v26 = vpack.c.bf16 %v1342_v23, %v1341_v15  ;;  %v1509_v36 = vadd.f32 %v1508_v20, %v1342_v23  ;;  %v1544_v28 = vmul.f32 %v1342_v23, %v1342_v23 }
 0x1eb   : > { %1898 = vst [vmem:[%s2744_s14 + $0x38] sm:$0xff] %v1860_v24   ;;  %v1312_v24 = vpop.permute.xlu1 %1311 }
 0x1ec   : > { %1897 = vst [vmem:[%s2744_s14 + $0x30] sm:$0xff] %v1855_v26   ;;  %v1510_v49 = vadd.f32 %v1509_v36, %v1343_v17  ;;  %v1571_v31 = vadd.f32 %v1570_v25, %v1544_v28  ;;  %v1317_v25 = vpop.permute.xlu0 %1316 }
 0x1ee   : > { %v1572_v33 = vadd.f32 %v1571_v31, %v1545_v30  ;;  %v1511_v34 = vadd.f32 %v1510_v49, %v1344_v18 }
 0x1ef   : > { %v1322_v36 = vpop.permute.xlu1 %1321 }
 0x1f0   : > { %v1573_v35 = vadd.f32 %v1572_v33, %v1546_v32  ;;  %v1327_v30 = vpop.permute.xlu0 %1326 }
 0x204   : > { %v1946_v38 = vpop.f32.mrb[0].mxu1 }
 0x205   : > { %v1114_v41 = vpop.f32.mrb[1].mxu1  ;;  %v1347_v44 = vmul.f32 %v1946_v38, %v1282_v39 }
 0x206   : > { %v1345_v63 = vmul.f32 %v1272_v22, %v1114_v41  ;;  %v1947_v43 = vpop.f32.mrb[2].mxu1 }
 0x207   : > { %v1348_v46 = vmul.f32 %v1947_v43, %v1287_v42  ;;  %v1117_v48 = vpop.f32.mrb[3].mxu1  ;;  %v1549_v52 = vmul.f32 %v1347_v44, %v1347_v44 }
 0x208   : > { %v1512_v50 = vadd.f32 %v1511_v34, %v1345_v63  ;;  %v1547_v45 = vmul.f32 %v1345_v63, %v1345_v63  ;;  %v1346_v51 = vmul.f32 %v1277_v37, %v1117_v48 }
 0x209   : > { %v1870_v3 = vpack.c.bf16 %v1348_v46, %v1347_v44  ;;  %v1550_v53 = vmul.f32 %v1348_v46, %v1348_v46 }
 0x20a   : > { %v1574_v12 = vadd.f32 %v1573_v35, %v1547_v45  ;;  %v1865_v55 = vpack.c.bf16 %v1346_v51, %v1345_v63  ;;  %v1513_v0 = vadd.f32 %v1512_v50, %v1346_v51  ;;  %v1548_v29 = vmul.f32 %v1346_v51, %v1346_v51 }
 0x20b   : > { %1900 = vst [vmem:[%s2744_s14 + $0x48] sm:$0xff] %v1870_v3  }
 0x20c   : > { %1899 = vst [vmem:[%s2744_s14 + $0x40] sm:$0xff] %v1865_v55   ;;  %v1514_v47 = vadd.f32 %v1513_v0, %v1347_v44  ;;  %v1575_v1 = vadd.f32 %v1574_v12, %v1548_v29 }
 0x20e   : > { %v1576_v54 = vadd.f32 %v1575_v1, %v1549_v52  ;;  %v1515_v57 = vadd.f32 %v1514_v47, %v1348_v46 }
 0x210   : > { %v1577_v27 = vadd.f32 %v1576_v54, %v1550_v53 }
 0x224   : > { %v1950_v60 = vpop.f32.mrb[4].mxu1 }
 0x225   : > { %v1130_v9 = vpop.f32.mrb[5].mxu1  ;;  %v1351_v4 = vmul.f32 %v1950_v60, %v1302_v56 }
 0x226   : > { %v1349_v62 = vmul.f32 %v1292_v58, %v1130_v9  ;;  %v1951_v2 = vpop.f32.mrb[6].mxu1 }
 0x227   : > { %v1352_v40 = vmul.f32 %v1951_v2, %v1307_v61  ;;  %v1133_v5 = vpop.f32.mrb[7].mxu1  ;;  %v1553_v16 = vmul.f32 %v1351_v4, %v1351_v4 }
 0x228   : > { %v1516_v6 = vadd.f32 %v1515_v57, %v1349_v62  ;;  %v1551_v7 = vmul.f32 %v1349_v62, %v1349_v62  ;;  %v1350_v8 = vmul.f32 %v1297_v59, %v1133_v5 }
 0x229   : > { %v1880_v10 = vpack.c.bf16 %v1352_v40, %v1351_v4  ;;  %v1554_v19 = vmul.f32 %v1352_v40, %v1352_v40 }
 0x22a   : > { %v1578_v11 = vadd.f32 %v1577_v27, %v1551_v7  ;;  %v1875_v13 = vpack.c.bf16 %v1350_v8, %v1349_v62  ;;  %v1517_v14 = vadd.f32 %v1516_v6, %v1350_v8  ;;  %v1552_v15 = vmul.f32 %v1350_v8, %v1350_v8 }
 0x22b   : > { %1902 = vst [vmem:[%s2744_s14 + $0x58] sm:$0xff] %v1880_v10  }
 0x22c   : > { %1901 = vst [vmem:[%s2744_s14 + $0x50] sm:$0xff] %v1875_v13   ;;  %v1518_v17 = vadd.f32 %v1517_v14, %v1351_v4  ;;  %v1579_v18 = vadd.f32 %v1578_v11, %v1552_v15 }
 0x22e   : > { %v1580_v20 = vadd.f32 %v1579_v18, %v1553_v16  ;;  %v1519_v21 = vadd.f32 %v1518_v17, %v1352_v40 }
 0x230   : > { %v1581_v23 = vadd.f32 %v1580_v20, %v1554_v19 }
 0x241   : > { %v1954_v26 = vpop.f32.mrb[8].mxu1 }
 0x242   : > { %v1146_v28 = vpop.f32.mrb[9].mxu1  ;;  %v1355_v32 = vmul.f32 %v1954_v26, %v1322_v36 }
 0x243   : > { %v1353_v49 = vmul.f32 %v1312_v24, %v1146_v28  ;;  %v1955_v31 = vpop.f32.mrb[10].mxu1 }
 0x244   : > { %v1356_v33 = vmul.f32 %v1955_v31, %v1327_v30  ;;  %v1149_v34 = vpop.f32.mrb[11].mxu1  ;;  %v1557_v43 = vmul.f32 %v1355_v32, %v1355_v32 }
 0x245   : > { %v1520_v35 = vadd.f32 %v1519_v21, %v1353_v49  ;;  %v1555_v22 = vmul.f32 %v1353_v49, %v1353_v49  ;;  %v1354_v37 = vmul.f32 %v1317_v25, %v1149_v34 }
 0x246   : > { %v1890_v38 = vpack.c.bf16 %v1356_v33, %v1355_v32 }
 0x247   : > { %v1582_v39 = vadd.f32 %v1581_v23, %v1555_v22  ;;  %v1885_v41 = vpack.c.bf16 %v1354_v37, %v1353_v49  ;;  %v1521_v42 = vadd.f32 %v1520_v35, %v1354_v37  ;;  %v1556_v63 = vmul.f32 %v1354_v37, %v1354_v37 }
 0x248   : > { %1904 = vst [vmem:[%s2744_s14 + $0x68] sm:$0xff] %v1890_v38  }
 0x249   : > { %1903 = vst [vmem:[%s2744_s14 + $0x60] sm:$0xff] %v1885_v41   ;;  %v1522_v44 = vadd.f32 %v1521_v42, %v1355_v32  ;;  %v1583_v46 = vadd.f32 %v1582_v39, %v1556_v63 }
 0x24a   : > { %2058 = shalt.err (!%p2055_p3)
}
 0x24b   : > { %s2059_s8 = scalar_lea.hbm %s2765_s28, 1792  ;;  %s2063_s13 = scalar_lea.hbm %s2845_s3, 3584 }
 0x24c   : > { %p2060_p4 = scmp.ne.s32.totalorder %s2765_s28, %s2059_s8  ;;  %p2064_p9 = scmp.lt.u32.totalorder %s2765_s28, %s2845_s3 }
 0x24d   : > { %p2065_p10 = scmp.lt.u32.totalorder %s2063_s13, %s2059_s8  ;;  %p2067_p12 = scmp.lt.u32.totalorder %s2059_s8, %s2765_s28 }
 0x24e   : > { %p2061_p7 = pnand %p2060_p4, %p2216_p5 }
 0x24f   : > { %p2066_p11 = por %p2065_p10, %p2064_p9 }
 0x250   : > { %p2062_p8 = pneg %p2061_p7 }
 0x251   : > { %p2068_p13 = por %p2067_p12, %p2066_p11 }
 0x253   : > { %p2069_p0 = pnand %p2068_p13, %p2062_p8 }
 0x255   : > { %2072 = shalt.err (!%p2069_p0)
}
 0x256   : > { %s2151_s23 = smov 64   ;;  %v1558_v48 = vmul.f32 %v1356_v33, %v1356_v33  ;;  %v1523_v50 = vadd.f32 %v1522_v44, %v1356_v33  ;;  %v1584_v45 = vadd.f32 %v1583_v46, %v1557_v43  ;;  %s1723_s27 = sshll.u32 %s2741_s12, 1 }
 0x257   : > { %1967 = dma.vmem_to_hbm [thread:$0]  (%p2216_p5), %s2760_s22, 1792, %s2765_s28, %s1594_s29, %s2151_s23, %s2151_s23, %s2144_s9  }
 0x258   : > { %v1524_v51 = vrot.slane %v1523_v50, 4  ;;  %v1585_v3 = vadd.f32 %v1584_v45, %v1558_v48  ;;  %s1791_s30 = sshll.u32 %s2199_s19, 5  ;;  %s201_s5 = scalar_lea.vmem [#allocation4], %s1723_s27 }
 0x259   : > { %s1628_s6 = sshll.u32 %s201_s5, 4  ;;  %s2799_s28 = scalar_lea.hbm %s2846_s4, %s1791_s30  ;;  %s2801_s6 = int_to_ptr.vmem [resolvable:$true] %s1628_s6 }
 0x25a   : > { %v1525_v12 = vadd.f32 %v1524_v51, %v1523_v50  ;;  %v1586_v55 = vrot.slane %v1585_v3, 4  ;;  %s1599_s29 = scalar_lea.sflag [#allocation5], %s2741_s12  ;;  %s2073_s7 = scalar_lea.vmem %s2801_s6, 32 }
 0x25b   : > { %p2074_p1 = scmp.ne.s32.totalorder %s2801_s6, %s2073_s7  ;;  %s2152_s19 = smov [#allocation4]  }
 0x25c   : > { %v1526_v0 = vrot.slane %v1525_v12, 2  ;;  %v1587_v29 = vadd.f32 %v1586_v55, %v1585_v3  ;;  %s2077_s8 = sshll.u32 %s2152_s19, 4  ;;  %s2078_s8 = int_to_ptr.vmem [resolvable:$false] %s2077_s8 }
 0x25d   : > { %p2075_p2 = pnand %p2074_p1, %p2216_p5  ;;  %s2079_s10 = scalar_lea.vmem %s2078_s8, 64 }
 0x25e   : > { %v1527_v52 = vadd.f32 %v1526_v0, %v1525_v12  ;;  %v1588_v47 = vrot.slane %v1587_v29, 2  ;;  %p2080_p4 = scmp.lt.s32.totalorder %s2801_s6, %s2078_s8  ;;  %p2081_p7 = scmp.lt.s32.totalorder %s2079_s10, %s2073_s7 }
 0x25f   : > { %p2076_p3 = pneg %p2075_p2 }
 0x260   : > { %v1528_v1 = vrot.slane %v1527_v52, 1  ;;  %v1589_v53 = vadd.f32 %v1588_v47, %v1587_v29  ;;  %p2082_p8 = por %p2081_p7, %p2080_p4 }
 0x262   : > { %v1529_v54 = vadd.f32 %v1528_v1, %v1527_v52  ;;  %v1590_v57 = vrot.slane %v1589_v53, 1  ;;  %p2083_p9 = pnand %p2082_p8, %p2076_p3 }
 0x264   : > { %1530 = vst [vmem:[%s201_s5] sm:$0x1] %v1529_v54  ;;  %v1591_v27 = vadd.f32 %v1590_v57, %v1589_v53 }
 0x266   : > { %1592 = vst [vmem:[%s201_s5 + $0x1] sm:$0x1] %v1591_v27 }
 0x267   : > { %2086 = shalt.err (!%p2083_p9)
}
 0x268   : > { %s2087_s12 = scalar_lea.hbm %s2799_s28, 32  ;;  %s2091_s14 = scalar_lea.hbm %s2846_s4, 64 }
 0x269   : > { %p2088_p10 = scmp.ne.s32.totalorder %s2799_s28, %s2087_s12  ;;  %p2092_p13 = scmp.lt.u32.totalorder %s2799_s28, %s2846_s4 }
 0x26a   : > { %p2093_p0 = scmp.lt.u32.totalorder %s2091_s14, %s2087_s12  ;;  %p2095_p2 = scmp.lt.u32.totalorder %s2087_s12, %s2799_s28 }
 0x26b   : > { %p2089_p11 = pnand %p2088_p10, %p2216_p5 }
 0x26c   : > { %p2094_p1 = por %p2093_p0, %p2092_p13 }
 0x26d   : > { %p2090_p12 = pneg %p2089_p11 }
 0x26e   : > { %p2096_p3 = por %p2095_p2, %p2094_p1 }
 0x270   : > { %p2097_p4 = pnand %p2096_p3, %p2090_p12 }
 0x272   : > { %2100 = shalt.err (!%p2097_p4)
}
 0x273   : > { %1968 = dma.vmem_to_hbm [thread:$0]  (%p2216_p5), %s2801_s6, 32, %s2799_s28, %s1599_s29  }
 0x274 PF: > { %p1978_p7 = scmp.ge.s32.totalorder %s2139_s18, 2  ;;  %s1640_s27 = sand.u32 1, %s2127_s15  }
 0x275   : > { %s1641_s30 = scalar_lea.sflag [#allocation3], %s1640_s27 }
 0x276   : > { %p1972_p8 = pnand %p1978_p7, %p2220_p6 }
 0x278   : > { %2118 = dma.done.wait (!%p1972_p8), %s1641_s30, 1792  }
 0x279   : > { %2120 = vsyncadd (!%p1972_p8), %s1641_s30, 4294965504  ;;  %s1650_s5 = scalar_lea.sflag [#allocation5], %s1640_s27 }
 0x27a   : > { %2122 = dma.done.wait (!%p1972_p8), %s1650_s5, 32  }
 0x27b   : > { %2124 = vsyncadd (!%p1972_p8), %s1650_s5, 4294967264  ;;  %p18_p5 = scmp.ge.s32.totalorder %s2203_s21, 4   ;;  %s2849_s15 = smov %s2131_s16 }
 0x27c   : > { %s2850_s16 = smov %s2135_s17  ;;  %s2851_s17 = smov %s2214_s24 }
 0x27d   : > { %s2852_s18 = smov %s2203_s21  ;;  %20 = sbr.rel (!%p18_p5) target bundleno = 5 (0x5), region = 84 }
 0x284   :  { %1655 = vsyncpa [#allocation3], 1 }
 0x285   :  { %1657 = vsyncpa [#allocation3 + $0x1], 1 }
 0x286   :  { %1658 = vsyncpa [#allocation5], 1 }
 0x287   :  { %1660 = vsyncpa [#allocation5 + $0x1], 1 }

</bundles_post_ra>
